<compile_context>
chip_gen: v7x
topology: tpu7x:2x2x1
jax: 0.10.0
libtpu: 0.0.40
codegen_flags: <defaults>
</compile_context>

<pallas_src>
import math
import jax
import jax.numpy as jnp
from jax.experimental import pallas as pl
from jax.experimental.pallas import tpu as pltpu

C_PAD = 128  # padded channel width for lane-dense conv outputs


# ----------------------------------------------------------------------------
# Pallas kernel: fused matmul + bias + ReLU, tiled over M.
# ----------------------------------------------------------------------------
def _matmul_bias_relu_kernel(x_ref, w_ref, b_ref, o_ref):
    acc = jnp.dot(x_ref[...], w_ref[...], preferred_element_type=jnp.float32)
    o_ref[...] = jnp.maximum(acc + b_ref[...], 0.0).astype(o_ref.dtype)


def matmul_bias_relu(x, w, b, *, out_dtype=jnp.float32, tm=256):
    """y = relu(x @ w + b).  x: (M, K) bf16, w: (K, N) bf16, b: (1, N) f32."""
    M, K = x.shape
    K2, N = w.shape
    assert K == K2 and b.shape == (1, N)

    x = x.astype(jnp.bfloat16)
    w = w.astype(jnp.bfloat16)
    b = b.astype(jnp.float32)

    if M <= tm:
        tm_eff, grid_m = M, 1          # single full-M block (full-array dims OK)
    else:
        tm_eff, grid_m = tm, pl.cdiv(M, tm)  # edge block padded/discarded by Pallas

    # VMEM budget: double-buffered x/out tiles + resident weight + bias + margin.
    vmem_bytes = 2 * (tm_eff * K * 2 + tm_eff * N * 4) + K * N * 2 + N * 4 + (2 << 20)
    vmem_bytes = int(min(max(vmem_bytes, 32 << 20), 48 << 20))  # cap for v7x 64 MiB

    return pl.pallas_call(
        _matmul_bias_relu_kernel,
        out_shape=jax.ShapeDtypeStruct((M, N), out_dtype),
        grid=(grid_m,),
        in_specs=[
            pl.BlockSpec((tm_eff, K), lambda i: (i, 0)),   # activations: tiled over M
            pl.BlockSpec((K, N), lambda i: (0, 0)),        # weights: resident
            pl.BlockSpec((1, N), lambda i: (0, 0)),        # bias: resident
        ],
        out_specs=pl.BlockSpec((tm_eff, N), lambda i: (i, 0)),
        compiler_params=pltpu.CompilerParams(
            dimension_semantics=("parallel",),             # v7x: shard M across TCs
            vmem_limit_bytes=vmem_bytes),
    )(x, w, b)


# ----------------------------------------------------------------------------
# Glue: im2col patch extraction (pure reshapes/slices, stays in plain JAX).
# ----------------------------------------------------------------------------
def im2col(x, kh, kw, stride):
    """x: (N, H, W, C) -> (N*OH*OW, KH*KW*C), OH, OW.  Patch order (kh, kw, c)."""
    n, h, w, c = x.shape
    oh = (h - kh) // stride + 1
    ow = (w - kw) // stride + 1
    cols = []
    for i in range(kh):
        for j in range(kw):
            cols.append(x[:, i:i + stride * oh:stride,
                          j:j + stride * ow:stride, :])   # (N, OH, OW, C)
    patches = jnp.stack(cols, axis=3)                     # (N, OH, OW, KH*KW, C)
    return patches.reshape(n * oh * ow, kh * kw * c), oh, ow


# ----------------------------------------------------------------------------
# Deterministic parameter init (mimics torch orthogonal_ with relu gain),
# with all matmul-form / padded / bf16 weight layouts baked in.
# ----------------------------------------------------------------------------
def orthogonal(key, rows, cols, gain):
    a = jax.random.normal(key, (max(rows, cols), min(rows, cols)),
                          dtype=jnp.float32)
    q, r = jnp.linalg.qr(a)
    q = q * jnp.sign(jnp.diag(r))[None, :]
    if rows < cols:
        q = q.T
    return gain * q[:rows, :cols]


def conv_weight_to_matmul(w, ic_pad, oc_pad):
    """(OC, IC, KH, KW) torch layout -> (KH*KW*IC_pad, OC_pad), zero-padded."""
    oc, ic, kh, kw = w.shape
    wt = jnp.transpose(w, (2, 3, 1, 0))                      # (KH, KW, IC, OC)
    wt = jnp.pad(wt, ((0, 0), (0, 0), (0, ic_pad - ic), (0, oc_pad - oc)))
    return wt.reshape(kh * kw * ic_pad, oc_pad)


def fc1_weight_to_matmul(w, c_pad):
    """(512, 32*5*8) torch layout -> (5*8*c_pad, 512) consuming padded-NHWC flatten."""
    wt = w.reshape(512, 32, 5, 8)                            # (out, C, H, W)
    wt = jnp.transpose(wt, (2, 3, 1, 0))                     # (H, W, C, out)
    wt = jnp.pad(wt, ((0, 0), (0, 0), (0, c_pad - 32), (0, 0)))
    return wt.reshape(5 * 8 * c_pad, 512)


def init_params(key):
    gain = math.sqrt(2.0)  # calculate_gain('relu')
    k1, k2, k3, k4 = jax.random.split(key, 4)
    # PyTorch layouts, then converted once to padded matmul form (bf16).
    w1 = orthogonal(k1, 32, 16 * 8 * 8, gain).reshape(32, 16, 8, 8)
    w2 = orthogonal(k2, 64, 32 * 4 * 4, gain).reshape(64, 32, 4, 4)
    w3 = orthogonal(k3, 32, 64 * 3 * 3, gain).reshape(32, 64, 3, 3)
    wf = orthogonal(k4, 512, 32 * 5 * 8, gain)               # (512, 1280)
    # conv2/conv3 consume the 128-padded channel outputs of the previous layer,
    # so pad their IC rows too (padded channels are exactly zero -> no effect).
    w2p = jnp.pad(w2, ((0, 0), (0, C_PAD - 32), (0, 0), (0, 0)))
    w3p = jnp.pad(w3, ((0, 0), (0, C_PAD - 64), (0, 0), (0, 0)))
    bf16 = jnp.bfloat16
    return dict(
        conv1_wm=conv_weight_to_matmul(w1, 16, C_PAD).astype(bf16),     # (1024, 128)
        conv1_b=jnp.zeros((1, C_PAD), jnp.float32),
        conv2_wm=conv_weight_to_matmul(w2p, C_PAD, C_PAD).astype(bf16),  # (2048, 128)
        conv2_b=jnp.zeros((1, C_PAD), jnp.float32),
        conv3_wm=conv_weight_to_matmul(w3p, C_PAD, C_PAD).astype(bf16),  # (1152, 128)
        conv3_b=jnp.zeros((1, C_PAD), jnp.float32),
        fc1_wm=fc1_weight_to_matmul(wf, C_PAD).astype(bf16),             # (5120, 512)
        fc1_b=jnp.zeros((1, 512), jnp.float32),
    )


# ----------------------------------------------------------------------------
# Forward pass == PPO_net.forward
# ----------------------------------------------------------------------------
def ppo_net_forward(params, x_nchw):
    n = x_nchw.shape[0]
    x = jnp.transpose(x_nchw, (0, 2, 3, 1)).astype(jnp.bfloat16)  # NHWC, bf16

    for name, k, s in (("conv1", 8, 4), ("conv2", 4, 2), ("conv3", 3, 1)):
        patches, oh, ow = im2col(x, k, k, s)
        out = matmul_bias_relu(patches, params[name + "_wm"], params[name + "_b"],
                               out_dtype=jnp.bfloat16)       # (M, 128) lane-dense
        x = out.reshape(n, oh, ow, C_PAD)                    # padded NHWC

    # NCHW-flatten permutation is baked into fc1_wm, so just flatten padded NHWC.
    feat = x.reshape(n, 5 * 8 * C_PAD)                       # (N, 5120)
    y = matmul_bias_relu(feat, params["fc1_wm"], params["fc1_b"],
                         out_dtype=jnp.float32)              # (N, 512)
    return y


if __name__ == "__main__":
    key = jax.random.PRNGKey(0)
    pkey, xkey = jax.random.split(key)
    params = init_params(pkey)
    # Spatial 68x92 is required so conv3 output is 5x8 (fc1 expects 32*5*8).
    x = jax.random.normal(xkey, (2, 16, 68, 92), dtype=jnp.float32)
    y = ppo_net_forward(params, x)
    jax.block_until_ready(y)
    assert y.shape == (2, 512)
    assert bool(jnp.all(y >= 0.0))  # ReLU output
    print("KERNEL_OK")
</pallas_src>

<mosaic_0001>
module attributes {stable_mosaic.version = 11 : i64} {
  func.func @_matmul_bias_relu_kernel(%arg0: i32, %arg1: memref<256x1024xbf16, #tpu.memory_space<vmem>>, %arg2: memref<1024x128xbf16, #tpu.memory_space<vmem>>, %arg3: memref<1x128xf32, #tpu.memory_space<vmem>>, %arg4: memref<256x128xbf16, #tpu.memory_space<vmem>>) attributes {dimension_semantics = [#tpu.dimension_semantics<parallel>], iteration_bounds = array<i64: 3>, scalar_prefetch = 0 : i64, scratch_operands = 0 : i64, tpu.core_type = #tpu.core_type<tc>, window_params = [{transform_indices = @transform_0, window_bounds = array<i64: 256, 1024>}, {pipeline_mode = #tpu.pipeline_mode<synchronous>, transform_indices = @transform_1, window_bounds = array<i64: 1024, 128>}, {pipeline_mode = #tpu.pipeline_mode<synchronous>, transform_indices = @transform_2, window_bounds = array<i64: 1, 128>}, {transform_indices = @transform_3, window_bounds = array<i64: 256, 128>}]} {
    %c0 = arith.constant 0 : index
    %c0_0 = arith.constant 0 : index
    %0 = vector.load %arg1[%c0, %c0_0] : memref<256x1024xbf16, #tpu.memory_space<vmem>>, vector<256x1024xbf16>
    %c0_1 = arith.constant 0 : index
    %c0_2 = arith.constant 0 : index
    %1 = vector.load %arg2[%c0_1, %c0_2] : memref<1024x128xbf16, #tpu.memory_space<vmem>>, vector<1024x128xbf16>
    %cst = arith.constant dense<0.000000e+00> : vector<256x128xf32>
    %2 = tpu.matmul %0, %1, %cst {dimension_numbers = #tpu.dot_dimension_numbers<[1], [0], [0], [1], [0, 0, 1, 1], [], []>} : vector<256x1024xbf16>, vector<1024x128xbf16>, vector<256x128xf32> -> vector<256x128xf32>
    %c0_3 = arith.constant 0 : index
    %c0_4 = arith.constant 0 : index
    %3 = vector.load %arg3[%c0_3, %c0_4] : memref<1x128xf32, #tpu.memory_space<vmem>>, vector<1x128xf32>
    %4 = vector.broadcast %3 : vector<1x128xf32> to vector<256x128xf32>
    %5 = arith.addf %2, %4 : vector<256x128xf32>
    %cst_5 = arith.constant 0.000000e+00 : f32
    %6 = vector.broadcast %cst_5 : f32 to vector<256x128xf32>
    %7 = arith.maximumf %5, %6 : vector<256x128xf32>
    %8 = arith.truncf %7 : vector<256x128xf32> to vector<256x128xbf16>
    %c0_6 = arith.constant 0 : index
    %c0_7 = arith.constant 0 : index
    %9 = vector.load %arg4[%c0_6, %c0_7] : memref<256x128xbf16, #tpu.memory_space<vmem>>, vector<256x128xbf16>
    tpu.vector_store %arg4[%c0_6, %c0_7], %8 {strides = array<i32>} : memref<256x128xbf16, #tpu.memory_space<vmem>>, vector<256x128xbf16>,
    return
  }
  func.func @transform_0(%arg0: i32) -> (i32, i32) {
    %c0_i32 = arith.constant 0 : i32
    %c0_i32_0 = arith.constant 0 : i32
    return %arg0, %c0_i32 : i32, i32
  }
  func.func @transform_1(%arg0: i32) -> (i32, i32) {
    %c0_i32 = arith.constant 0 : i32
    %c0_i32_0 = arith.constant 0 : i32
    %c0_i32_1 = arith.constant 0 : i32
    return %c0_i32, %c0_i32_0 : i32, i32
  }
  func.func @transform_2(%arg0: i32) -> (i32, i32) {
    %c0_i32 = arith.constant 0 : i32
    %c0_i32_0 = arith.constant 0 : i32
    %c0_i32_1 = arith.constant 0 : i32
    return %c0_i32, %c0_i32_0 : i32, i32
  }
  func.func @transform_3(%arg0: i32) -> (i32, i32) {
    %c0_i32 = arith.constant 0 : i32
    %c0_i32_0 = arith.constant 0 : i32
    return %arg0, %c0_i32 : i32, i32
  }
}

</mosaic_0001>

<bundles_post_ra>
// kernel: tpu_custom_call.1
= control target key start
LH: loop header
LB: loop body
LE: loop exit
PB: predicated region body
PF: predicated region fallthrough
CT: control target
= control target key end

     0   :  { %8 = vsyncpa [#allocation3], 0  ;;  %s4142_s0 = inlined_call_operand.hbm [shape: bf16[704,1024], index: 0, kind: input, shape index: {}]   ;;  %s4143_s1 = inlined_call_operand.hbm [shape: bf16[1024,128], index: 1, kind: input, shape index: {}]   ;;  %s4144_s2 = inlined_call_operand.hbm [shape: f32[1,128], index: 2, kind: input, shape index: {}]   ;;  %s4145_s3 = inlined_call_operand.hbm [shape: bf16[704,128], index: 3, kind: output, shape index: {}]  }
   0x1   :  { %10 = vsyncpa [#allocation3 + $0x1], 0 }
   0x2   :  { %11 = vsyncpa [#allocation6], 0 }
   0x3   :  { %12 = vsyncpa [#allocation4], 0 }
   0x4   :  { %14 = vsyncpa [#allocation4 + $0x1], 0  ;;  %s3619_s12 = smov 0   ;;  %s3621_s13 = smov 0  }
   0x5   :  { %s3623_s14 = smov 0   ;;  %s3625_s15 = smov 0  }
   0x6 LB: > { %s3640_s16 = sadd.s32 4294967295, %s3587_s15   ;;  %s2471_s17 = sadd.s32 4294967294, %s3587_s15   ;;  %s3587_s15 = sphi %s3625_s15, %s4165_s15   ;;  %s3583_s14 = sphi %s3623_s14, %s4164_s14   ;;  %s3579_s13 = sphi %s3621_s13, %s4163_s13   ;;  %s3575_s12 = sphi %s3619_s12, %s4162_s12  }
   0x7   : > { %s3644_s18 = sadd.s32 1, %s3587_s15   ;;  %s27_s19 = sadd.s32 1, %s3583_s14 }
   0x8   : > { %s24_s20 = ssub.s32 %s3587_s15, %s3644_s18  ;;  %p34_p0 = scmp.ne.s32.totalorder %s3583_s14, %s3579_s13 }
   0x9   : > { %p25_p1 = scmp.eq.s32.totalorder %s24_s20, 0  ;;  %p35_p2 = scmp.eq.s32.totalorder %s3587_s15, 0 }
   0xa   : > { %p40_p3 = scmp.ne.s32.totalorder %s3579_s13, %s3575_s12  ;;  %p4146_p4 = scmp.eq.s32.totalorder %s3640_s16, 0 }
   0xb   : > { %s3656_s21 = scalar_select %p25_p1, %s3583_s14, %s27_s19  }
   0xc   : > { %p3658_p5 = por %p35_p2, %p34_p0  ;;  %p3664_p6 = por %p4146_p4, %p40_p3 }
   0xd   : > { %p106_p7 = scmp.eq.s32.totalorder %s3640_s16, 2  ;;  %p112_p8 = scmp.eq.s32.totalorder %s2471_s17, 2 }
   0xe   : > { %s4149_s22 = scalar_select %p3658_p5, 1, 0 }
   0xf   : > { %s4150_s23 = scalar_select %p3664_p6, 1, 0 }
  0x10   : > { %p2472_p9 = scmp.ge.s32.totalorder %s3587_s15, 1  ;;  %p119_p10 = scmp.lt.s32.totalorder %s3587_s15, 4 }
  0x11   : > { %p3671_p11 = por %p106_p7, %p34_p0  ;;  %p3675_p12 = por %p112_p8, %p40_p3 }
  0x12   : > { %p3679_p13 = pnand %p2472_p9, %p119_p10  ;;  %s3589_s27 = smov [#allocation5]  }
  0x13   : > { %s4151_s24 = scalar_select %p3671_p11, 1, 0 }
  0x14   : > { %s4152_s25 = scalar_select %p3675_p12, 1, 0 }
  0x15   : > { %s4153_s26 = scalar_select %p3679_p13, 1, 0 }
  0x16   : > { %p3313_p1 = pneg %p3679_p13  ;;  %s131_s28 = sshll.u32 %s3589_s27, 4  ;;  %s132_s28 = int_to_ptr.vmem [resolvable:$true] %s131_s28 }
  0x17   : > { %s3590_s30 = smov [#allocation7]   ;;  %s3433_s7 = scalar_lea.hbm %s4143_s1, 8192 }
  0x18   : > { %p3687_p2 = pnand %p3313_p1, %p4146_p4  ;;  %s145_s4 = sshll.u32 %s3590_s30, 4  ;;  %s3691_s4 = int_to_ptr.vmem [resolvable:$true] %s145_s4 }
  0x19   : > { %p3434_p0 = scmp.ne.s32.totalorder %s4143_s1, %s3433_s7  ;;  %p3440_p9 = scmp.lt.u32.totalorder %s3433_s7, %s4143_s1 }
  0x1a   : > { %p3435_p3 = pneg %p3687_p2 }
  0x1c   : > { %p3436_p7 = pnand %p3435_p3, %p3434_p0 }
  0x1e   : > { %p3437_p8 = pneg %p3436_p7 }
  0x20   : > { %p3442_p10 = pnand %p3440_p9, %p3437_p8 }
  0x22   : > { %3445 = shalt.err (!%p3442_p10)
}
  0x23   : > { %s3446_s17 = scalar_lea.vmem %s132_s28, 8192  ;;  %p3454_p11 = scmp.lt.s32.totalorder %s132_s28, %s132_s28 }
  0x24   : > { %p3447_p1 = scmp.ne.s32.totalorder %s132_s28, %s3446_s17  ;;  %p3455_p6 = scmp.lt.s32.totalorder %s3446_s17, %s3446_s17 }
  0x26   : > { %p3449_p4 = pnand %p3447_p1, %p3435_p3  ;;  %p3456_p13 = por %p3455_p6, %p3454_p11 }
  0x28   : > { %p3450_p12 = pneg %p3449_p4 }
  0x2a   : > { %p3457_p5 = pnand %p3456_p13, %p3450_p12 }
  0x2c   : > { %3460 = shalt.err (!%p3457_p5)
}
  0x2d   : > { %s3591_s19 = smov 64   ;;  %s3592_s20 = smov 4  }
  0x2e   : > { %3316 = dma.hbm_to_vmem [thread:$0]  (!%p3687_p2), %s4143_s1, 8192, %s132_s28, [#allocation6], %s3591_s19, %s3591_s19, %s3592_s20  }
  0x2f   : > { %s3461_s7 = scalar_lea.hbm %s4144_s2, 16 }
  0x30   : > { %p3462_p4 = scmp.ne.s32.totalorder %s4144_s2, %s3461_s7  ;;  %p3468_p11 = scmp.lt.u32.totalorder %s3461_s7, %s4144_s2 }
  0x32   : > { %p3464_p5 = pnand %p3462_p4, %p3435_p3 }
  0x34   : > { %p3465_p6 = pneg %p3464_p5 }
  0x36   : > { %p3470_p12 = pnand %p3468_p11, %p3465_p6 }
  0x38   : > { %3473 = shalt.err (!%p3470_p12)
}
  0x39   : > { %s3474_s28 = scalar_lea.vmem %s3691_s4, 16  ;;  %s3481_s17 = scalar_lea.vmem %s3691_s4, 32 }
  0x3a   : > { %p3475_p13 = scmp.ne.s32.totalorder %s3691_s4, %s3474_s28  ;;  %p3482_p8 = scmp.lt.s32.totalorder %s3691_s4, %s3691_s4 }
  0x3b   : > { %p3483_p9 = scmp.lt.s32.totalorder %s3481_s17, %s3474_s28 }
  0x3c   : > { %p3477_p0 = pnand %p3475_p13, %p3435_p3 }
  0x3d   : > { %p3484_p10 = por %p3483_p9, %p3482_p8 }
  0x3e   : > { %p3478_p7 = pneg %p3477_p0 }
  0x40   : > { %p3485_p1 = pnand %p3484_p10, %p3478_p7 }
  0x42   : > { %3488 = shalt.err (!%p3485_p1)
}
  0x43   : > { %3319 = dma.hbm_to_vmem [thread:$0]  (!%p3687_p2), %s4144_s2, 16, %s3691_s4, [#allocation6]  }
  0x44   : > { %p2475_p4 = scmp.ge.s32.totalorder %s3587_s15, 3 }
  0x45   : > { %p4155_p3 = scmp.ne.s32.totalorder (!%p2475_p4), %s4149_s22, 0 }
  0x46   : > { %152 = sbr.rel (%p2475_p4) target bundleno = 112 (0x70), region = 24 }
  0x4d   : > { %155 = sbr.rel (!%p4155_p3) target bundleno = 112 (0x70), region = 28  ;;  %s156_s27 = sand.u32 (%p4155_p3), 1, %s3583_s14  }
  0x4e   : > { %s2477_s30 = sshll.u32 (%p4155_p3), %s3587_s15, 5  ;;  %s2476_s5 = sshll.u32 (%p4155_p3), %s156_s27, 10 }
  0x4f   : > { %s162_s6 = ssub.s32 (%p4155_p3), 88, %s2477_s30  ;;  %s3749_s8 = scalar_lea.sflag (%p4155_p3), [#allocation3], %s156_s27 }
  0x50   : > { %p163_p5 = scmp.lt.s32.totalorder (%p4155_p3), %s162_s6, 32  ;;  %s160_s4 = scalar_lea.vmem (%p4155_p3), [#allocation2], %s2476_s5 }
  0x54   : > { %s4167_s6 = smov (!%p163_p5, %s162_s6), 32 }
  0x55   : > { %s3746_s29 = sshll.u32 %s4167_s6, 9 }
  0x56   : > { %s168_s7 = ssub.s32 16384, %s3746_s29 }
  0x57   : > { %169 = vsyncadd %s3749_s8, %s168_s7  ;;  %p2480_p2 = scmp.ne.s32.totalorder %s3746_s29, 0  ;;  %s2726_s22 = sshll.u32 %s3587_s15, 14 }
  0x58   : > { %s3757_s11 = scalar_lea.hbm %s4142_s0, %s2726_s22  ;;  %s175_s28 = sshll.u32 %s160_s4, 4  ;;  %s3759_s28 = int_to_ptr.vmem [resolvable:$true] %s175_s28 }
  0x59   : > { %s3489_s17 = scalar_lea.hbm %s3757_s11, %s3746_s29  ;;  %s3493_s27 = scalar_lea.hbm %s4142_s0, 45056 }
  0x5a   : > { %p3490_p6 = scmp.ne.s32.totalorder %s3757_s11, %s3489_s17  ;;  %p3494_p13 = scmp.lt.u32.totalorder %s3757_s11, %s4142_s0 }
  0x5b   : > { %p3495_p0 = scmp.lt.u32.totalorder %s3493_s27, %s3489_s17  ;;  %p3497_p8 = scmp.lt.u32.totalorder %s3489_s17, %s3757_s11 }
  0x5c   : > { %p3491_p11 = pnand %p3490_p6, %p2480_p2 }
  0x5d   : > { %p3496_p7 = por %p3495_p0, %p3494_p13 }
  0x5e   : > { %p3492_p12 = pneg %p3491_p11 }
  0x5f   : > { %p3498_p9 = por %p3497_p8, %p3496_p7 }
  0x61   : > { %p3499_p10 = pnand %p3498_p9, %p3492_p12 }
  0x63   : > { %3502 = shalt.err (!%p3499_p10)
}
  0x64   : > { %s3503_s6 = scalar_lea.vmem %s3759_s28, %s3746_s29  ;;  %s3593_s7 = smov [#allocation2]  }
  0x65   : > { %p3504_p1 = scmp.ne.s32.totalorder %s3759_s28, %s3503_s6  ;;  %s3507_s4 = sshll.u32 %s3593_s7, 4  ;;  %s3508_s4 = int_to_ptr.vmem [resolvable:$false] %s3507_s4 }
  0x66   : > { %s3509_s22 = scalar_lea.vmem %s3508_s4, 32768  ;;  %p3510_p5 = scmp.lt.s32.totalorder %s3759_s28, %s3508_s4 }
  0x67   : > { %p3505_p4 = pnand %p3504_p1, %p2480_p2  ;;  %p3511_p6 = scmp.lt.s32.totalorder %s3509_s22, %s3503_s6 }
  0x69   : > { %p3506_p3 = pneg %p3505_p4  ;;  %p3512_p11 = por %p3511_p6, %p3510_p5 }
  0x6b   : > { %p3513_p13 = pnand %p3512_p11, %p3506_p3 }
  0x6d   : > { %3516 = shalt.err (!%p3513_p13)
}
  0x6e   : > { %s3594_s9 = smov 512   ;;  %s3595_s10 = smov 32  }
  0x6f   : > { %181 = dma.hbm_to_vmem [thread:$0]  (%p2480_p2), %s3757_s11, %s3746_s29, %s3759_s28, %s3749_s8, %s3594_s9, %s3594_s9, %s3595_s10  }
  0x70 PF: > { %p4156_p12 = scmp.ne.s32.totalorder %s4153_s26, 0 }
  0x71   : > { %s3789_s17 = sand.u32 (!%p4156_p12), 1, %s3579_s13   ;;  %p4157_p0 = scmp.ne.s32.totalorder (!%p4156_p12), %s4150_s23, 0 }
  0x72   : > { %187 = sbr.rel (%p4156_p12) target bundleno = 661 (0x295), region = 32  ;;  %s2486_s19 = sshll.u32 (!%p4156_p12), %s3789_s17, 10 }
  0x73   : > { %s190_s20 = scalar_lea.sflag (!%p4156_p12), [#allocation3], %s3789_s17  ;;  %s3793_s27 = scalar_lea.vmem (!%p4156_p12), [#allocation2], %s2486_s19 }
  0x79   : > { %3562 = dma.done.wait (%p4157_p0), %s190_s20, 16384  }
  0x7a   : > { %3564 = vsyncadd (%p4157_p0), %s190_s20, 4294950912  ;;  %p4158_p2 = scmp.eq.s32.totalorder %s3640_s16, 0 }
  0x7c   : > { %3566 = dma.done.wait (%p4158_p2), [#allocation6], 8208   ;;  %p4159_p7 = pmov %p4158_p2 }
  0x7d   : > { %v3369_v0 = vld [vmem:[#allocation5 + $0x40] sm:$0xff]   ;;  %v3373_v4 = vld [vmem:[#allocation5 + $0x48] sm:$0xff]   ;;  %v3377_v8 = vld [vmem:[#allocation5 + $0x50] sm:$0xff]   ;;  %s2489_s23 = sshll.u32 %s3789_s17, 7  ;;  %s2360_s29 = scalar_lea.sflag [#allocation4], %s3789_s17 }
  0x7e   : > { %3568 = vsyncadd (%p4159_p7), [#allocation6], 4294959088  ;;  %v3370_v1 = vld [vmem:[#allocation5 + $0xc0] sm:$0xff]   ;;  %2855 = vmatprep.subr.bf16.mxu0 %v3369_v0  ;;  %v3374_v5 = vld [vmem:[#allocation5 + $0xc8] sm:$0xff]   ;;  %s4033_s26 = scalar_lea.vmem [#allocation8], %s2489_s23  ;;  %p4160_p8 = scmp.ne.s32.totalorder %s4151_s24, 0 }
  0x7f   : > { %v3371_v2 = vld [vmem:[#allocation5] sm:$0xff]   ;;  %2967 = vmatprep.subr.bf16.mxu1 %v3370_v1  ;;  %v3375_v6 = vld [vmem:[#allocation5 + $0x8] sm:$0xff]   ;;  %v3378_v9 = vld [vmem:[#allocation5 + $0xd0] sm:$0xff]   ;;  %s2716_s8 = sshll.u32 (%p4160_p8), %s3640_s16, 5 }
  0x80   : > { %v3372_v3 = vld [vmem:[#allocation5 + $0x80] sm:$0xff]   ;;  %2856 = vmatpush3.bf16.msra.mxu0 %v3371_v2  ;;  %v3376_v7 = vld [vmem:[#allocation5 + $0x88] sm:$0xff]   ;;  %v3379_v10 = vld [vmem:[#allocation5 + $0x10] sm:$0xff]   ;;  %s2368_s11 = ssub.s32 (%p4160_p8), 88, %s2716_s8 }
  0x81   : > { %2968 = vmatpush3.bf16.msra.mxu1 %v3372_v3  ;;  %2857 = vmatprep.subr.bf16.mxu0 %v3373_v4  ;;  %v3380_v11 = vld [vmem:[#allocation5 + $0x90] sm:$0xff]   ;;  %v3381_v12 = vld [vmem:[#allocation5 + $0x58] sm:$0xff]   ;;  %v3385_v16 = vld [vmem:[#allocation5 + $0x60] sm:$0xff]   ;;  %p2369_p9 = scmp.lt.s32.totalorder (%p4160_p8), %s2368_s11, 32 }
  0x82   : > { %2969 = vmatprep.subr.bf16.mxu1 %v3374_v5  ;;  %v3382_v13 = vld [vmem:[#allocation5 + $0xd8] sm:$0xff]   ;;  %v3386_v17 = vld [vmem:[#allocation5 + $0xe0] sm:$0xff]   ;;  %v3389_v20 = vld [vmem:[#allocation5 + $0x68] sm:$0xff]  }
  0x83   : > { %v3383_v14 = vld [vmem:[#allocation5 + $0x18] sm:$0xff]   ;;  %v3387_v18 = vld [vmem:[#allocation5 + $0x20] sm:$0xff]   ;;  %v3390_v21 = vld [vmem:[#allocation5 + $0xe8] sm:$0xff]  }
  0x84   : > { %2858 = vmatpush3.bf16.msra.mxu0 %v3375_v6  ;;  %v3384_v15 = vld [vmem:[#allocation5 + $0x98] sm:$0xff]   ;;  %v3388_v19 = vld [vmem:[#allocation5 + $0xa0] sm:$0xff]   ;;  %v3391_v22 = vld [vmem:[#allocation5 + $0x28] sm:$0xff]  }
  0x85   : > { %2970 = vmatpush3.bf16.msra.mxu1 %v3376_v7  ;;  %2859 = vmatprep.subr.bf16.mxu0 %v3377_v8  ;;  %v3392_v23 = vld [vmem:[#allocation5 + $0xa8] sm:$0xff]   ;;  %v3393_v24 = vld [vmem:[#allocation5 + $0x70] sm:$0xff]   ;;  %v3397_v28 = vld [vmem:[#allocation5 + $0x78] sm:$0xff]  }
  0x86   : > { %2971 = vmatprep.subr.bf16.mxu1 %v3378_v9  ;;  %v3394_v25 = vld [vmem:[#allocation5 + $0xf0] sm:$0xff]   ;;  %v3398_v29 = vld [vmem:[#allocation5 + $0xf8] sm:$0xff]   ;;  %v236_v32 = vld [vmem:[%s3793_s27] sm:$0xff] }
  0x87   : > { %v3395_v26 = vld [vmem:[#allocation5 + $0x30] sm:$0xff]   ;;  %v3399_v30 = vld [vmem:[#allocation5 + $0x38] sm:$0xff]   ;;  %v240_v33 = vld [vmem:[%s3793_s27 + $0x20] sm:$0xff] }
  0x88   : > { %2860 = vmatpush3.bf16.msra.mxu0 %v3379_v10  ;;  %v3396_v27 = vld [vmem:[#allocation5 + $0xb0] sm:$0xff]   ;;  %v3400_v31 = vld [vmem:[#allocation5 + $0xb8] sm:$0xff]   ;;  %v237_v34 = vld [vmem:[%s3793_s27 + $0x8] sm:$0xff]  ;;  %v2491_v35 = vcombine.low %v236_v32, %v240_v33  ;;  %v2492_v36 = vcombine.high %v236_v32, %v240_v33 }
  0x89   : > { %2972 = vmatpush3.bf16.msra.mxu1 %v3380_v11  ;;  %2861 = vmatprep.subr.bf16.mxu0 %v3381_v12  ;;  %v241_v37 = vld [vmem:[%s3793_s27 + $0x28] sm:$0xff]  ;;  %v3401_v40 = vld [vmem:[#allocation5 + $0x140] sm:$0xff]   ;;  %v3409_v2 = vld [vmem:[#allocation5 + $0x150] sm:$0xff]  }
  0x8a   : > { %2973 = vmatprep.subr.bf16.mxu1 %v3382_v13  ;;  %v2493_v38 = vcombine.low %v237_v34, %v241_v37  ;;  %v2494_v39 = vcombine.high %v237_v34, %v241_v37  ;;  %1555 = vmatprep.mubr.bf16.mxu0 %v2492_v36  ;;  %v3402_v41 = vld [vmem:[#allocation5 + $0x100] sm:$0xff]   ;;  %v245_v47 = vld [vmem:[%s3793_s27 + $0x48] sm:$0xff]  ;;  %v3410_v4 = vld [vmem:[#allocation5 + $0x110] sm:$0xff]  }
  0x8b   : > { %v3403_v42 = vld [vmem:[#allocation5 + $0x1c0] sm:$0xff]   ;;  %v249_v48 = vld [vmem:[%s3793_s27 + $0x68] sm:$0xff]  ;;  %v3411_v7 = vld [vmem:[#allocation5 + $0x1d0] sm:$0xff]  }
  0x8c   : > { %2862 = vmatpush3.bf16.msra.mxu0 %v3383_v14  ;;  %1716 = vmatprep.mubr.bf16.mxu1 %v2494_v39  ;;  %v3404_v43 = vld [vmem:[#allocation5 + $0x180] sm:$0xff]   ;;  %v2502_v50 = vcombine.high %v245_v47, %v249_v48  ;;  %v253_v52 = vld [vmem:[%s3793_s27 + $0x88] sm:$0xff]  ;;  %v2501_v56 = vcombine.low %v245_v47, %v249_v48  ;;  %v3412_v9 = vld [vmem:[#allocation5 + $0x190] sm:$0xff]  }
  0x8d   : > { %2974 = vmatpush3.bf16.msra.mxu1 %v3384_v15  ;;  %2863 = vmatprep.subr.bf16.mxu0 %v3385_v16  ;;  %v244_v44 = vld [vmem:[%s3793_s27 + $0x40] sm:$0xff]  ;;  %v257_v53 = vld [vmem:[%s3793_s27 + $0xa8] sm:$0xff]  ;;  %v3413_v14 = vld [vmem:[#allocation5 + $0x158] sm:$0xff]  }
  0x8e   : > { %2975 = vmatprep.subr.bf16.mxu1 %v3386_v17  ;;  %v248_v45 = vld [vmem:[%s3793_s27 + $0x60] sm:$0xff]  ;;  %v3405_v55 = vld [vmem:[#allocation5 + $0x148] sm:$0xff]   ;;  %v2510_v59 = vcombine.high %v253_v52, %v257_v53  ;;  %v2509_v5 = vcombine.low %v253_v52, %v257_v53  ;;  %v3414_v15 = vld [vmem:[#allocation5 + $0x118] sm:$0xff]  }
  0x8f   : > { %v2500_v46 = vcombine.high %v244_v44, %v248_v45  ;;  %v252_v49 = vld [vmem:[%s3793_s27 + $0x80] sm:$0xff]  ;;  %v2499_v54 = vcombine.low %v244_v44, %v248_v45  ;;  %v3406_v58 = vld [vmem:[#allocation5 + $0x108] sm:$0xff]   ;;  %v3415_v17 = vld [vmem:[#allocation5 + $0x1d8] sm:$0xff]  }
  0x90   : > { %2864 = vmatpush3.bf16.msra.mxu0 %v3387_v18  ;;  %v256_v51 = vld [vmem:[%s3793_s27 + $0xa0] sm:$0xff]  ;;  %v3407_v60 = vld [vmem:[#allocation5 + $0x1c8] sm:$0xff]   ;;  %v3426_v47 = vld [vmem:[#allocation5 + $0x130] sm:$0xff]  }
  0x91   : > { %2976 = vmatpush3.bf16.msra.mxu1 %v3388_v19  ;;  %2865 = vmatprep.subr.bf16.mxu0 %v3389_v20  ;;  %v2508_v57 = vcombine.high %v252_v49, %v256_v51  ;;  %v3408_v61 = vld [vmem:[#allocation5 + $0x188] sm:$0xff]   ;;  %v260_v62 = vld [vmem:[%s3793_s27 + $0xc0] sm:$0xff]  ;;  %v2507_v3 = vcombine.low %v252_v49, %v256_v51  ;;  %v3416_v20 = vld [vmem:[#allocation5 + $0x198] sm:$0xff]  }
  0x92   : > { %2977 = vmatprep.subr.bf16.mxu1 %v3390_v21  ;;  %v264_v63 = vld [vmem:[%s3793_s27 + $0xe0] sm:$0xff]  ;;  %v261_v0 = vld [vmem:[%s3793_s27 + $0xc8] sm:$0xff]  ;;  %v3427_v48 = vld [vmem:[#allocation5 + $0x1f0] sm:$0xff]  }
  0x93   : > { %v265_v1 = vld [vmem:[%s3793_s27 + $0xe8] sm:$0xff]  ;;  %v2516_v6 = vcombine.high %v260_v62, %v264_v63  ;;  %v268_v10 = vld [vmem:[%s3793_s27 + $0x100] sm:$0xff]  ;;  %v2515_v16 = vcombine.low %v260_v62, %v264_v63  ;;  %v3428_v49 = vld [vmem:[#allocation5 + $0x1b0] sm:$0xff]  }
  0x94   : > { %2866 = vmatpush3.bf16.msra.mxu0 %v3391_v22  ;;  %v2518_v8 = vcombine.high %v261_v0, %v265_v1  ;;  %v272_v11 = vld [vmem:[%s3793_s27 + $0x120] sm:$0xff]  ;;  %v269_v12 = vld [vmem:[%s3793_s27 + $0x108] sm:$0xff]  ;;  %v2517_v18 = vcombine.low %v261_v0, %v265_v1 }
  0x95   : > { %2978 = vmatpush3.bf16.msra.mxu1 %v3392_v23  ;;  %2867 = vmatprep.subr.bf16.mxu0 %v3393_v24  ;;  %v273_v13 = vld [vmem:[%s3793_s27 + $0x128] sm:$0xff]  ;;  %v2524_v19 = vcombine.high %v268_v10, %v272_v11  ;;  %v276_v22 = vld [vmem:[%s3793_s27 + $0x140] sm:$0xff] }
  0x96   : > { %2979 = vmatprep.subr.bf16.mxu1 %v3394_v25  ;;  %v2526_v21 = vcombine.high %v269_v12, %v273_v13  ;;  %v280_v23 = vld [vmem:[%s3793_s27 + $0x160] sm:$0xff]  ;;  %v277_v25 = vld [vmem:[%s3793_s27 + $0x148] sm:$0xff] }
  0x97   : > { %v3417_v24 = vld [vmem:[#allocation5 + $0x160] sm:$0xff]   ;;  %v2532_v32 = vcombine.high %v276_v22, %v280_v23  ;;  %v3421_v34 = vld [vmem:[#allocation5 + $0x168] sm:$0xff]  }
  0x98   : > { %2868 = vmatpush3.bf16.msra.mxu0 %v3395_v26  ;;  %v281_v26 = vld [vmem:[%s3793_s27 + $0x168] sm:$0xff]  ;;  %v296_v51 = vld [vmem:[%s3793_s27 + $0x1e0] sm:$0xff] }
  0x99   : > { %2980 = vmatpush3.bf16.msra.mxu1 %v3396_v27  ;;  %2869 = vmatprep.subr.bf16.mxu0 %v3397_v28  ;;  %v3418_v27 = vld [vmem:[#allocation5 + $0x120] sm:$0xff]   ;;  %v2534_v33 = vcombine.high %v277_v25, %v281_v26  ;;  %v3422_v36 = vld [vmem:[#allocation5 + $0x128] sm:$0xff]  }
  0x9a   : > { %2981 = vmatprep.subr.bf16.mxu1 %v3398_v29  ;;  %v3419_v28 = vld [vmem:[#allocation5 + $0x1e0] sm:$0xff]   ;;  %v3423_v37 = vld [vmem:[#allocation5 + $0x1e8] sm:$0xff]  }
  0x9b   : > { %v3420_v29 = vld [vmem:[#allocation5 + $0x1a0] sm:$0xff]   ;;  %v3424_v39 = vld [vmem:[#allocation5 + $0x1a8] sm:$0xff]  }
  0x9c   : > { %2870 = vmatpush3.bf16.msra.mxu0 %v3399_v30  ;;  %v2523_v30 = vcombine.low %v268_v10, %v272_v11  ;;  %v293_v52 = vld [vmem:[%s3793_s27 + $0x1c8] sm:$0xff]  ;;  %v300_v62 = vld [vmem:[%s3793_s27 + $0x200] sm:$0xff] }
  0x9d   : > { %2982 = vmatpush3.bf16.msra.mxu1 %v3400_v31  ;;  %3079 = vmatprep.subr.bf16.mxu0 %v3401_v40  ;;  %v2525_v31 = vcombine.low %v269_v12, %v273_v13  ;;  %v285_v40 = vld [vmem:[%s3793_s27 + $0x188] sm:$0xff]  ;;  %v304_v63 = vld [vmem:[%s3793_s27 + $0x220] sm:$0xff] }
  0x9e   : > { %3191 = vmatprep.subr.bf16.mxu1 %v3403_v42  ;;  %v2531_v42 = vcombine.low %v276_v22, %v280_v23  ;;  %v297_v53 = vld [vmem:[%s3793_s27 + $0x1e8] sm:$0xff]  ;;  %v2555_v10 = vcombine.low %v300_v62, %v304_v63  ;;  %v324_v22 = vld [vmem:[%s3793_s27 + $0x2c0] sm:$0xff] }
  0x9f   : > { %1556 = vmatmul.mubr.bf16.vlgmr.msra.gmra.mrb[0].mxu0 %v2491_v35  ;;  %v284_v35 = vld [vmem:[%s3793_s27 + $0x180] sm:$0xff]  ;;  %v301_v0 = vld [vmem:[%s3793_s27 + $0x208] sm:$0xff] }
  0xa0   : > { %1717 = vmatmul.mubr.bf16.vlgmr.msra.gmra.mrb[0].mxu1 %v2493_v38  ;;  %3080 = vmatpush3.bf16.msra.mxu0 %v3402_v41  ;;  %v288_v38 = vld [vmem:[%s3793_s27 + $0x1a0] sm:$0xff]  ;;  %v289_v41 = vld [vmem:[%s3793_s27 + $0x1a8] sm:$0xff] }
  0xa1   : > { %3192 = vmatpush3.bf16.msra.mxu1 %v3404_v43  ;;  %1563 = vmatprep.mubr.bf16.mxu0 %v2500_v46  ;;  %v2533_v43 = vcombine.low %v277_v25, %v281_v26  ;;  %v2540_v44 = vcombine.high %v284_v35, %v288_v38  ;;  %v2542_v45 = vcombine.high %v285_v40, %v289_v41  ;;  %v3425_v46 = vld [vmem:[#allocation5 + $0x170] sm:$0xff]   ;;  %v305_v1 = vld [vmem:[%s3793_s27 + $0x228] sm:$0xff]  ;;  %v328_v23 = vld [vmem:[%s3793_s27 + $0x2e0] sm:$0xff] }
  0xa2   : > { %1724 = vmatprep.mubr.bf16.mxu1 %v2502_v50  ;;  %3081 = vmatprep.subr.bf16.mxu0 %v3405_v55  ;;  %v292_v50 = vld [vmem:[%s3793_s27 + $0x1c0] sm:$0xff]  ;;  %v3429_v55 = vld [vmem:[#allocation5 + $0x178] sm:$0xff]   ;;  %v2557_v11 = vcombine.low %v301_v0, %v305_v1  ;;  %v329_v25 = vld [vmem:[%s3793_s27 + $0x2e8] sm:$0xff] }
  0xa3   : > { %3193 = vmatprep.subr.bf16.mxu1 %v3407_v60  ;;  %v3431_v60 = vld [vmem:[#allocation5 + $0x1f8] sm:$0xff]  }
  0xa4   : > { %3082 = vmatpush3.bf16.msra.mxu0 %v3406_v58  ;;  %v3430_v58 = vld [vmem:[#allocation5 + $0x138] sm:$0xff]  }
  0xa5   : > { %3194 = vmatpush3.bf16.msra.mxu1 %v3408_v61  ;;  %3083 = vmatprep.subr.bf16.mxu0 %v3409_v2  ;;  %v3432_v61 = vld [vmem:[#allocation5 + $0x1b8] sm:$0xff]   ;;  %v2547_v2 = vcombine.low %v292_v50, %v296_v51 }
  0xa6   : > { %3195 = vmatprep.subr.bf16.mxu1 %v3411_v7  ;;  %v312_v7 = vld [vmem:[%s3793_s27 + $0x260] sm:$0xff] }
  0xa7   : > { %1564 = vmatmul.mubr.bf16.gmra.mrb[4].mxu0 %v2499_v54  ;;  %v2539_v54 = vcombine.low %v284_v35, %v288_v38  ;;  %v340_v38 = vld [vmem:[%s3793_s27 + $0x340] sm:$0xff] }
  0xa8   : > { %1725 = vmatmul.mubr.bf16.gmra.mrb[4].mxu1 %v2501_v56  ;;  %1571 = vmatprep.mubr.bf16.mxu0 %v2508_v57  ;;  %v2541_v56 = vcombine.low %v285_v40, %v289_v41  ;;  %v2548_v57 = vcombine.high %v292_v50, %v296_v51  ;;  %v341_v40 = vld [vmem:[%s3793_s27 + $0x348] sm:$0xff] }
  0xa9   : > { %1732 = vmatprep.mubr.bf16.mxu1 %v2510_v59  ;;  %3084 = vmatpush3.bf16.msra.mxu0 %v3410_v4  ;;  %v2550_v59 = vcombine.high %v293_v52, %v297_v53  ;;  %v2556_v4 = vcombine.high %v300_v62, %v304_v63  ;;  %v345_v41 = vld [vmem:[%s3793_s27 + $0x368] sm:$0xff]  ;;  %v238_v62 = vld [vmem:[%s3793_s27 + $0x10] sm:$0xff] }
  0xaa   : > { %3196 = vmatpush3.bf16.msra.mxu1 %v3412_v9  ;;  %3085 = vmatprep.subr.bf16.mxu0 %v3413_v14  ;;  %v313_v9 = vld [vmem:[%s3793_s27 + $0x268] sm:$0xff]  ;;  %v316_v14 = vld [vmem:[%s3793_s27 + $0x280] sm:$0xff]  ;;  %v2597_v51 = vcombine.low %v341_v40, %v345_v41  ;;  %v242_v63 = vld [vmem:[%s3793_s27 + $0x30] sm:$0xff] }
  0xab   : > { %3197 = vmatprep.subr.bf16.mxu1 %v3415_v17  ;;  %v321_v17 = vld [vmem:[%s3793_s27 + $0x2a8] sm:$0xff] }
  0xad   : > { %3086 = vmatpush3.bf16.msra.mxu0 %v3414_v15  ;;  %v320_v15 = vld [vmem:[%s3793_s27 + $0x2a0] sm:$0xff] }
  0xae   : > { %3198 = vmatpush3.bf16.msra.mxu1 %v3416_v20  ;;  %3087 = vmatprep.subr.bf16.mxu0 %v3417_v24  ;;  %v2572_v20 = vcombine.high %v316_v14, %v320_v15  ;;  %v325_v24 = vld [vmem:[%s3793_s27 + $0x2c8] sm:$0xff]  ;;  %v2571_v26 = vcombine.low %v316_v14, %v320_v15  ;;  %v254_v14 = vld [vmem:[%s3793_s27 + $0x90] sm:$0xff] }
  0xaf   : > { %1572 = vmatmul.mubr.bf16.gmra.mrb[8].mxu0 %v2507_v3  ;;  %3199 = vmatprep.subr.bf16.mxu1 %v3419_v28  ;;  %v2549_v3 = vcombine.low %v293_v52, %v297_v53  ;;  %v2580_v28 = vcombine.high %v324_v22, %v328_v23  ;;  %v2581_v35 = vcombine.low %v325_v24, %v329_v25  ;;  %v258_v15 = vld [vmem:[%s3793_s27 + $0xb0] sm:$0xff] }
  0xb0   : > { %1733 = vmatmul.mubr.bf16.gmra.mrb[8].mxu1 %v2509_v5  ;;  %1579 = vmatprep.mubr.bf16.mxu0 %v2516_v6  ;;  %v2558_v5 = vcombine.high %v301_v0, %v305_v1  ;;  %v308_v6 = vld [vmem:[%s3793_s27 + $0x240] sm:$0xff]  ;;  %v239_v0 = vld [vmem:[%s3793_s27 + $0x18] sm:$0xff] }
  0xb1   : > { %1740 = vmatprep.mubr.bf16.mxu1 %v2518_v8  ;;  %3088 = vmatpush3.bf16.msra.mxu0 %v3418_v27  ;;  %v309_v8 = vld [vmem:[%s3793_s27 + $0x248] sm:$0xff]  ;;  %v2564_v12 = vcombine.high %v308_v6, %v312_v7  ;;  %v243_v1 = vld [vmem:[%s3793_s27 + $0x38] sm:$0xff] }
  0xb2   : > { %3200 = vmatpush3.bf16.msra.mxu1 %v3420_v29  ;;  %3089 = vmatprep.subr.bf16.mxu0 %v3421_v34  ;;  %v2566_v13 = vcombine.high %v309_v8, %v313_v9  ;;  %v2582_v29 = vcombine.high %v325_v24, %v329_v25  ;;  %v2579_v34 = vcombine.low %v324_v22, %v328_v23  ;;  %v262_v22 = vld [vmem:[%s3793_s27 + $0xd0] sm:$0xff]  ;;  %v263_v24 = vld [vmem:[%s3793_s27 + $0xd8] sm:$0xff] }
  0xb3   : > { %3201 = vmatprep.subr.bf16.mxu1 %v3423_v37  ;;  %v266_v23 = vld [vmem:[%s3793_s27 + $0xf0] sm:$0xff]  ;;  %v267_v25 = vld [vmem:[%s3793_s27 + $0xf8] sm:$0xff] }
  0xb5   : > { %3090 = vmatpush3.bf16.msra.mxu0 %v3422_v36 }
  0xb6   : > { %3202 = vmatpush3.bf16.msra.mxu1 %v3424_v39  ;;  %3091 = vmatprep.subr.bf16.mxu0 %v3425_v46  ;;  %v344_v39 = vld [vmem:[%s3793_s27 + $0x360] sm:$0xff] }
  0xb7   : > { %1580 = vmatmul.mubr.bf16.gmra.mrb[12].mxu0 %v2515_v16  ;;  %3203 = vmatprep.subr.bf16.mxu1 %v3427_v48  ;;  %v317_v16 = vld [vmem:[%s3793_s27 + $0x288] sm:$0xff]  ;;  %v348_v46 = vld [vmem:[%s3793_s27 + $0x380] sm:$0xff]  ;;  %v2595_v50 = vcombine.low %v340_v38, %v344_v39 }
  0xb8   : > { %1741 = vmatmul.mubr.bf16.gmra.mrb[12].mxu1 %v2517_v18  ;;  %1587 = vmatprep.mubr.bf16.mxu0 %v2524_v19  ;;  %v2563_v18 = vcombine.low %v308_v6, %v312_v7  ;;  %v2565_v19 = vcombine.low %v309_v8, %v313_v9  ;;  %v2573_v27 = vcombine.low %v317_v16, %v321_v17  ;;  %v349_v48 = vld [vmem:[%s3793_s27 + $0x388] sm:$0xff]  ;;  %v246_v6 = vld [vmem:[%s3793_s27 + $0x50] sm:$0xff]  ;;  %v247_v8 = vld [vmem:[%s3793_s27 + $0x58] sm:$0xff] }
  0xb9   : > { %1748 = vmatprep.mubr.bf16.mxu1 %v2526_v21  ;;  %3092 = vmatpush3.bf16.msra.mxu0 %v3426_v47  ;;  %v2574_v21 = vcombine.high %v317_v16, %v321_v17  ;;  %v352_v47 = vld [vmem:[%s3793_s27 + $0x3a0] sm:$0xff]  ;;  %v250_v7 = vld [vmem:[%s3793_s27 + $0x70] sm:$0xff]  ;;  %v251_v9 = vld [vmem:[%s3793_s27 + $0x78] sm:$0xff] }
  0xba   : > { %3204 = vmatpush3.bf16.msra.mxu1 %v3428_v49  ;;  %3093 = vmatprep.subr.bf16.mxu0 %v3429_v55  ;;  %v353_v49 = vld [vmem:[%s3793_s27 + $0x3a8] sm:$0xff]  ;;  %v2604_v52 = vcombine.high %v348_v46, %v352_v47  ;;  %v360_v55 = vld [vmem:[%s3793_s27 + $0x3e0] sm:$0xff]  ;;  %v255_v16 = vld [vmem:[%s3793_s27 + $0x98] sm:$0xff] }
  0xbb   : > { %3205 = vmatprep.subr.bf16.mxu1 %v3431_v60  ;;  %v2606_v53 = vcombine.high %v349_v48, %v353_v49  ;;  %v259_v17 = vld [vmem:[%s3793_s27 + $0xb8] sm:$0xff] }
  0xbd   : > { %3094 = vmatpush3.bf16.msra.mxu0 %v3430_v58  ;;  %v2603_v58 = vcombine.low %v348_v46, %v352_v47  ;;  %v286_v46 = vld [vmem:[%s3793_s27 + $0x190] sm:$0xff] }
  0xbe   : > { %3206 = vmatpush3.bf16.msra.mxu1 %v3432_v61  ;;  %v290_v47 = vld [vmem:[%s3793_s27 + $0x1b0] sm:$0xff] }
  0xbf   : > { %1588 = vmatmul.mubr.bf16.gmra.mrb[16].mxu0 %v2523_v30  ;;  %v332_v30 = vld [vmem:[%s3793_s27 + $0x300] sm:$0xff] }
  0xc0   : > { %1749 = vmatmul.mubr.bf16.gmra.mrb[16].mxu1 %v2525_v31  ;;  %1595 = vmatprep.mubr.bf16.mxu0 %v2532_v32  ;;  %v336_v31 = vld [vmem:[%s3793_s27 + $0x320] sm:$0xff]  ;;  %v333_v32 = vld [vmem:[%s3793_s27 + $0x308] sm:$0xff] }
  0xc1   : > { %1756 = vmatprep.mubr.bf16.mxu1 %v2534_v33  ;;  %v337_v33 = vld [vmem:[%s3793_s27 + $0x328] sm:$0xff]  ;;  %v2588_v36 = vcombine.high %v332_v30, %v336_v31 }
  0xc2   : > { %v2590_v37 = vcombine.high %v333_v32, %v337_v33 }
  0xc7   : > { %1596 = vmatmul.mubr.bf16.gmra.mrb[20].mxu0 %v2531_v42  ;;  %v2587_v42 = vcombine.low %v332_v30, %v336_v31  ;;  %v270_v30 = vld [vmem:[%s3793_s27 + $0x110] sm:$0xff] }
  0xc8   : > { %1757 = vmatmul.mubr.bf16.gmra.mrb[20].mxu1 %v2533_v43  ;;  %1603 = vmatprep.mubr.bf16.mxu0 %v2540_v44  ;;  %v2589_v43 = vcombine.low %v333_v32, %v337_v33  ;;  %v2596_v44 = vcombine.high %v340_v38, %v344_v39  ;;  %v274_v31 = vld [vmem:[%s3793_s27 + $0x130] sm:$0xff]  ;;  %v271_v32 = vld [vmem:[%s3793_s27 + $0x118] sm:$0xff] }
  0xc9   : > { %1764 = vmatprep.mubr.bf16.mxu1 %v2542_v45  ;;  %v2598_v45 = vcombine.high %v341_v40, %v345_v41  ;;  %v275_v33 = vld [vmem:[%s3793_s27 + $0x138] sm:$0xff]  ;;  %v278_v38 = vld [vmem:[%s3793_s27 + $0x150] sm:$0xff] }
  0xca   : > { %v282_v39 = vld [vmem:[%s3793_s27 + $0x170] sm:$0xff]  ;;  %v279_v40 = vld [vmem:[%s3793_s27 + $0x158] sm:$0xff] }
  0xcb   : > { %v283_v41 = vld [vmem:[%s3793_s27 + $0x178] sm:$0xff] }
  0xcf   : > { %1604 = vmatmul.mubr.bf16.gmra.mrb[24].mxu0 %v2539_v54  ;;  %v356_v54 = vld [vmem:[%s3793_s27 + $0x3c0] sm:$0xff] }
  0xd0   : > { %1765 = vmatmul.mubr.bf16.gmra.mrb[24].mxu1 %v2541_v56  ;;  %1611 = vmatprep.mubr.bf16.mxu0 %v2548_v57  ;;  %v357_v56 = vld [vmem:[%s3793_s27 + $0x3c8] sm:$0xff]  ;;  %v2612_v60 = vcombine.high %v356_v54, %v360_v55 }
  0xd1   : > { %1772 = vmatprep.mubr.bf16.mxu1 %v2550_v59  ;;  %v361_v57 = vld [vmem:[%s3793_s27 + $0x3e8] sm:$0xff]  ;;  %v2605_v59 = vcombine.low %v349_v48, %v353_v49  ;;  %v287_v48 = vld [vmem:[%s3793_s27 + $0x198] sm:$0xff] }
  0xd2   : > { %v2614_v61 = vcombine.high %v357_v56, %v361_v57  ;;  %v291_v49 = vld [vmem:[%s3793_s27 + $0x1b8] sm:$0xff] }
  0xd7   : > { %1612 = vmatmul.mubr.bf16.gmra.mrb[28].mxu0 %v2547_v2  ;;  %v2611_v2 = vcombine.low %v356_v54, %v360_v55  ;;  %v294_v54 = vld [vmem:[%s3793_s27 + $0x1d0] sm:$0xff] }
  0xd8   : > { %1773 = vmatmul.mubr.bf16.gmra.mrb[28].mxu1 %v2549_v3  ;;  %1619 = vmatprep.mubr.bf16.mxu0 %v2556_v4  ;;  %v2613_v3 = vcombine.low %v357_v56, %v361_v57  ;;  %v2496_v4 = vcombine.high %v238_v62, %v242_v63  ;;  %v298_v55 = vld [vmem:[%s3793_s27 + $0x1f0] sm:$0xff]  ;;  %v295_v56 = vld [vmem:[%s3793_s27 + $0x1d8] sm:$0xff] }
  0xd9   : > { %1780 = vmatprep.mubr.bf16.mxu1 %v2558_v5  ;;  %v2498_v5 = vcombine.high %v239_v0, %v243_v1  ;;  %v299_v57 = vld [vmem:[%s3793_s27 + $0x1f8] sm:$0xff] }
  0xdf   : > { %1620 = vmatmul.mubr.bf16.gmra.mrb[32].mxu0 %v2555_v10  ;;  %v2495_v10 = vcombine.low %v238_v62, %v242_v63  ;;  %v302_v62 = vld [vmem:[%s3793_s27 + $0x210] sm:$0xff] }
  0xe0   : > { %1781 = vmatmul.mubr.bf16.gmra.mrb[32].mxu1 %v2557_v11  ;;  %1627 = vmatprep.mubr.bf16.mxu0 %v2564_v12  ;;  %v2497_v11 = vcombine.low %v239_v0, %v243_v1  ;;  %v2504_v12 = vcombine.high %v246_v6, %v250_v7  ;;  %v306_v63 = vld [vmem:[%s3793_s27 + $0x230] sm:$0xff]  ;;  %v303_v0 = vld [vmem:[%s3793_s27 + $0x218] sm:$0xff] }
  0xe1   : > { %1788 = vmatprep.mubr.bf16.mxu1 %v2566_v13  ;;  %v2506_v13 = vcombine.high %v247_v8, %v251_v9  ;;  %v307_v1 = vld [vmem:[%s3793_s27 + $0x238] sm:$0xff] }
  0xe7   : > { %1628 = vmatmul.mubr.bf16.gmra.mrb[36].mxu0 %v2563_v18  ;;  %v2503_v18 = vcombine.low %v246_v6, %v250_v7  ;;  %v310_v6 = vld [vmem:[%s3793_s27 + $0x250] sm:$0xff] }
  0xe8   : > { %1789 = vmatmul.mubr.bf16.gmra.mrb[36].mxu1 %v2565_v19  ;;  %1635 = vmatprep.mubr.bf16.mxu0 %v2572_v20  ;;  %v2505_v19 = vcombine.low %v247_v8, %v251_v9  ;;  %v2512_v20 = vcombine.high %v254_v14, %v258_v15  ;;  %v314_v7 = vld [vmem:[%s3793_s27 + $0x270] sm:$0xff]  ;;  %v311_v8 = vld [vmem:[%s3793_s27 + $0x258] sm:$0xff] }
  0xe9   : > { %1796 = vmatprep.mubr.bf16.mxu1 %v2574_v21  ;;  %v2514_v21 = vcombine.high %v255_v16, %v259_v17  ;;  %v315_v9 = vld [vmem:[%s3793_s27 + $0x278] sm:$0xff] }
  0xef   : > { %1636 = vmatmul.mubr.bf16.gmra.mrb[40].mxu0 %v2571_v26  ;;  %v2511_v26 = vcombine.low %v254_v14, %v258_v15  ;;  %v318_v14 = vld [vmem:[%s3793_s27 + $0x290] sm:$0xff] }
  0xf0   : > { %1797 = vmatmul.mubr.bf16.gmra.mrb[40].mxu1 %v2573_v27  ;;  %1643 = vmatprep.mubr.bf16.mxu0 %v2580_v28  ;;  %v2513_v27 = vcombine.low %v255_v16, %v259_v17  ;;  %v2520_v28 = vcombine.high %v262_v22, %v266_v23  ;;  %v322_v15 = vld [vmem:[%s3793_s27 + $0x2b0] sm:$0xff]  ;;  %v319_v16 = vld [vmem:[%s3793_s27 + $0x298] sm:$0xff] }
  0xf1   : > { %1804 = vmatprep.mubr.bf16.mxu1 %v2582_v29  ;;  %v2522_v29 = vcombine.high %v263_v24, %v267_v25  ;;  %v323_v17 = vld [vmem:[%s3793_s27 + $0x2b8] sm:$0xff] }
  0xf7   : > { %1644 = vmatmul.mubr.bf16.gmra.mrb[44].mxu0 %v2579_v34  ;;  %v2519_v34 = vcombine.low %v262_v22, %v266_v23  ;;  %v326_v22 = vld [vmem:[%s3793_s27 + $0x2d0] sm:$0xff] }
  0xf8   : > { %1805 = vmatmul.mubr.bf16.gmra.mrb[44].mxu1 %v2581_v35  ;;  %1651 = vmatprep.mubr.bf16.mxu0 %v2588_v36  ;;  %v2521_v35 = vcombine.low %v263_v24, %v267_v25  ;;  %v2528_v36 = vcombine.high %v270_v30, %v274_v31  ;;  %v330_v23 = vld [vmem:[%s3793_s27 + $0x2f0] sm:$0xff]  ;;  %v327_v24 = vld [vmem:[%s3793_s27 + $0x2d8] sm:$0xff] }
  0xf9   : > { %1812 = vmatprep.mubr.bf16.mxu1 %v2590_v37  ;;  %v2530_v37 = vcombine.high %v271_v32, %v275_v33  ;;  %v331_v25 = vld [vmem:[%s3793_s27 + $0x2f8] sm:$0xff] }
  0xff   : > { %1652 = vmatmul.mubr.bf16.gmra.mrb[48].mxu0 %v2587_v42  ;;  %v2527_v42 = vcombine.low %v270_v30, %v274_v31  ;;  %v334_v30 = vld [vmem:[%s3793_s27 + $0x310] sm:$0xff] }
 0x100   : > { %1813 = vmatmul.mubr.bf16.gmra.mrb[48].mxu1 %v2589_v43  ;;  %1659 = vmatprep.mubr.bf16.mxu0 %v2596_v44  ;;  %v2529_v43 = vcombine.low %v271_v32, %v275_v33  ;;  %v2536_v44 = vcombine.high %v278_v38, %v282_v39  ;;  %v338_v31 = vld [vmem:[%s3793_s27 + $0x330] sm:$0xff]  ;;  %v335_v33 = vld [vmem:[%s3793_s27 + $0x318] sm:$0xff] }
 0x101   : > { %1820 = vmatprep.mubr.bf16.mxu1 %v2598_v45  ;;  %v2538_v45 = vcombine.high %v279_v40, %v283_v41 }
 0x107   : > { %1660 = vmatmul.mubr.bf16.gmra.mrb[52].mxu0 %v2595_v50  ;;  %v2535_v50 = vcombine.low %v278_v38, %v282_v39  ;;  %v2583_v38 = vcombine.low %v326_v22, %v330_v23 }
 0x108   : > { %1821 = vmatmul.mubr.bf16.gmra.mrb[52].mxu1 %v2597_v51  ;;  %1667 = vmatprep.mubr.bf16.mxu0 %v2604_v52  ;;  %v2537_v51 = vcombine.low %v279_v40, %v283_v41  ;;  %v2544_v52 = vcombine.high %v286_v46, %v290_v47 }
 0x109   : > { %1828 = vmatprep.mubr.bf16.mxu1 %v2606_v53  ;;  %v2546_v53 = vcombine.high %v287_v48, %v291_v49 }
 0x10f   : > { %1668 = vmatmul.mubr.bf16.gmra.mrb[56].mxu0 %v2603_v58  ;;  %v2543_v58 = vcombine.low %v286_v46, %v290_v47 }
 0x110   : > { %1829 = vmatmul.mubr.bf16.gmra.mrb[56].mxu1 %v2605_v59  ;;  %1675 = vmatprep.mubr.bf16.mxu0 %v2612_v60  ;;  %v2545_v59 = vcombine.low %v287_v48, %v291_v49  ;;  %v2552_v60 = vcombine.high %v294_v54, %v298_v55 }
 0x111   : > { %1836 = vmatprep.mubr.bf16.mxu1 %v2614_v61  ;;  %v2554_v61 = vcombine.high %v295_v56, %v299_v57 }
 0x117   : > { %1676 = vmatmul.mubr.bf16.gmra.mrb[60].mxu0 %v2611_v2  ;;  %v2551_v2 = vcombine.low %v294_v54, %v298_v55  ;;  %v342_v54 = vld [vmem:[%s3793_s27 + $0x350] sm:$0xff] }
 0x118   : > { %1837 = vmatmul.mubr.bf16.gmra.mrb[60].mxu1 %v2613_v3  ;;  %1877 = vmatprep.mubr.bf16.mxu0 %v2496_v4  ;;  %v2553_v3 = vcombine.low %v295_v56, %v299_v57  ;;  %v2560_v4 = vcombine.high %v302_v62, %v306_v63  ;;  %v346_v55 = vld [vmem:[%s3793_s27 + $0x370] sm:$0xff] }
 0x119   : > { %2038 = vmatprep.mubr.bf16.mxu1 %v2498_v5  ;;  %v2562_v5 = vcombine.high %v303_v0, %v307_v1 }
 0x11f   : > { %1878 = vmatmul.mubr.bf16.vlgmr.msra.gmra.mrb[64].mxu0 %v2495_v10  ;;  %v2559_v10 = vcombine.low %v302_v62, %v306_v63  ;;  %v2591_v62 = vcombine.low %v334_v30, %v338_v31 }
 0x120   : > { %2039 = vmatmul.mubr.bf16.vlgmr.msra.gmra.mrb[64].mxu1 %v2497_v11  ;;  %1885 = vmatprep.mubr.bf16.mxu0 %v2504_v12  ;;  %v2561_v11 = vcombine.low %v303_v0, %v307_v1  ;;  %v2568_v12 = vcombine.high %v310_v6, %v314_v7 }
 0x121   : > { %2046 = vmatprep.mubr.bf16.mxu1 %v2506_v13  ;;  %v2570_v13 = vcombine.high %v311_v8, %v315_v9 }
 0x127   : > { %1886 = vmatmul.mubr.bf16.gmra.mrb[68].mxu0 %v2503_v18  ;;  %v2567_v18 = vcombine.low %v310_v6, %v314_v7 }
 0x128   : > { %2047 = vmatmul.mubr.bf16.gmra.mrb[68].mxu1 %v2505_v19  ;;  %1893 = vmatprep.mubr.bf16.mxu0 %v2512_v20  ;;  %v2569_v19 = vcombine.low %v311_v8, %v315_v9  ;;  %v2576_v20 = vcombine.high %v318_v14, %v322_v15 }
 0x129   : > { %2054 = vmatprep.mubr.bf16.mxu1 %v2514_v21  ;;  %v2578_v21 = vcombine.high %v319_v16, %v323_v17 }
 0x12f   : > { %1894 = vmatmul.mubr.bf16.gmra.mrb[72].mxu0 %v2511_v26  ;;  %v2575_v26 = vcombine.low %v318_v14, %v322_v15  ;;  %v350_v14 = vld [vmem:[%s3793_s27 + $0x390] sm:$0xff] }
 0x130   : > { %2055 = vmatmul.mubr.bf16.gmra.mrb[72].mxu1 %v2513_v27  ;;  %1901 = vmatprep.mubr.bf16.mxu0 %v2520_v28  ;;  %v2577_v27 = vcombine.low %v319_v16, %v323_v17  ;;  %v2584_v28 = vcombine.high %v326_v22, %v330_v23  ;;  %v354_v15 = vld [vmem:[%s3793_s27 + $0x3b0] sm:$0xff]  ;;  %v2599_v22 = vcombine.low %v342_v54, %v346_v55 }
 0x131   : > { %2062 = vmatprep.mubr.bf16.mxu1 %v2522_v29  ;;  %v2586_v29 = vcombine.high %v327_v24, %v331_v25 }
 0x137   : > { %1902 = vmatmul.mubr.bf16.gmra.mrb[76].mxu0 %v2519_v34  ;;  %v339_v34 = vld [vmem:[%s3793_s27 + $0x338] sm:$0xff] }
 0x138   : > { %2063 = vmatmul.mubr.bf16.gmra.mrb[76].mxu1 %v2521_v35  ;;  %1909 = vmatprep.mubr.bf16.mxu0 %v2528_v36  ;;  %v3919_v36 = vld [vmem:[#allocation7] ss:$0 sm:$0xff]  ;;  %v2594_v47 = vcombine.high %v335_v33, %v339_v34 }
 0x139   : > { %2070 = vmatprep.mubr.bf16.mxu1 %v2530_v37 }
 0x13f   : > { %1910 = vmatmul.mubr.bf16.gmra.mrb[80].mxu0 %v2527_v42  ;;  %v2585_v42 = vcombine.low %v327_v24, %v331_v25 }
 0x140   : > { %2071 = vmatmul.mubr.bf16.gmra.mrb[80].mxu1 %v2529_v43  ;;  %1917 = vmatprep.mubr.bf16.mxu0 %v2536_v44  ;;  %v2592_v43 = vcombine.high %v334_v30, %v338_v31 }
 0x141   : > { %2078 = vmatprep.mubr.bf16.mxu1 %v2538_v45 }
 0x147   : > { %1918 = vmatmul.mubr.bf16.gmra.mrb[84].mxu0 %v2535_v50 }
 0x148   : > { %2079 = vmatmul.mubr.bf16.gmra.mrb[84].mxu1 %v2537_v51  ;;  %1925 = vmatprep.mubr.bf16.mxu0 %v2544_v52 }
 0x149   : > { %2086 = vmatprep.mubr.bf16.mxu1 %v2546_v53 }
 0x14f   : > { %1926 = vmatmul.mubr.bf16.gmra.mrb[88].mxu0 %v2543_v58  ;;  %v343_v58 = vld [vmem:[%s3793_s27 + $0x358] sm:$0xff] }
 0x150   : > { %2087 = vmatmul.mubr.bf16.gmra.mrb[88].mxu1 %v2545_v59  ;;  %1933 = vmatprep.mubr.bf16.mxu0 %v2552_v60  ;;  %v347_v59 = vld [vmem:[%s3793_s27 + $0x378] sm:$0xff] }
 0x151   : > { %2094 = vmatprep.mubr.bf16.mxu1 %v2554_v61  ;;  %v2602_v7 = vcombine.high %v343_v58, %v347_v59 }
 0x157   : > { %1934 = vmatmul.mubr.bf16.gmra.mrb[92].mxu0 %v2551_v2  ;;  %v2593_v2 = vcombine.low %v335_v33, %v339_v34 }
 0x158   : > { %2095 = vmatmul.mubr.bf16.gmra.mrb[92].mxu1 %v2553_v3  ;;  %1941 = vmatprep.mubr.bf16.mxu0 %v2560_v4  ;;  %v2600_v3 = vcombine.high %v342_v54, %v346_v55 }
 0x159   : > { %2102 = vmatprep.mubr.bf16.mxu1 %v2562_v5 }
 0x15f   : > { %1942 = vmatmul.mubr.bf16.gmra.mrb[96].mxu0 %v2559_v10 }
 0x160   : > { %2103 = vmatmul.mubr.bf16.gmra.mrb[96].mxu1 %v2561_v11  ;;  %1949 = vmatprep.mubr.bf16.mxu0 %v2568_v12 }
 0x161   : > { %2110 = vmatprep.mubr.bf16.mxu1 %v2570_v13 }
 0x167   : > { %1950 = vmatmul.mubr.bf16.gmra.mrb[100].mxu0 %v2567_v18  ;;  %v351_v18 = vld [vmem:[%s3793_s27 + $0x398] sm:$0xff] }
 0x168   : > { %2111 = vmatmul.mubr.bf16.gmra.mrb[100].mxu1 %v2569_v19  ;;  %1957 = vmatprep.mubr.bf16.mxu0 %v2576_v20  ;;  %v355_v19 = vld [vmem:[%s3793_s27 + $0x3b8] sm:$0xff] }
 0x169   : > { %2118 = vmatprep.mubr.bf16.mxu1 %v2578_v21  ;;  %v2610_v31 = vcombine.high %v351_v18, %v355_v19 }
 0x16f   : > { %1958 = vmatmul.mubr.bf16.gmra.mrb[104].mxu0 %v2575_v26  ;;  %v2601_v26 = vcombine.low %v343_v58, %v347_v59 }
 0x170   : > { %2119 = vmatmul.mubr.bf16.gmra.mrb[104].mxu1 %v2577_v27  ;;  %1965 = vmatprep.mubr.bf16.mxu0 %v2584_v28  ;;  %v2608_v27 = vcombine.high %v350_v14, %v354_v15 }
 0x171   : > { %2126 = vmatprep.mubr.bf16.mxu1 %v2586_v29 }
 0x172   : > { %v2871_v32 = vpop.f32.mrb[0].mxu0 }
 0x173   : > { %v2983_v35 = vpop.f32.mrb[0].mxu1  ;;  %v2872_v37 = vpop.f32.mrb[1].mxu0 }
 0x174   : > { %v2873_v39 = vadd.f32 %v2872_v37, %v2871_v32  ;;  %v2984_v40 = vpop.f32.mrb[1].mxu1  ;;  %v2874_v41 = vpop.f32.mrb[2].mxu0 }
 0x175   : > { %v2985_v44 = vadd.f32 %v2984_v40, %v2983_v35  ;;  %v2986_v45 = vpop.f32.mrb[2].mxu1  ;;  %v2875_v46 = vpop.f32.mrb[3].mxu0  ;;  %v362_v40 = vld [vmem:[%s3793_s27 + $0x3f0] sm:$0xff] }
 0x176   : > { %v1558_v48 = vadd.f32 %v2873_v39, %v3919_v36  ;;  %v2876_v49 = vadd.f32 %v2875_v46, %v2874_v41  ;;  %v2987_v50 = vpop.f32.mrb[3].mxu1  ;;  %v358_v39 = vld [vmem:[%s3793_s27 + $0x3d0] sm:$0xff] }
 0x177   : > { %v2988_v51 = vadd.f32 %v2987_v50, %v2986_v45  ;;  %1966 = vmatmul.mubr.bf16.gmra.mrb[108].mxu0 %v2583_v38 }
 0x178   : > { %v3922_v52 = vadd.f32 %v2985_v44, %v1558_v48  ;;  %v1561_v53 = vadd.f32 %v2876_v49, %v3919_v36  ;;  %2127 = vmatmul.mubr.bf16.gmra.mrb[108].mxu1 %v2585_v42  ;;  %1973 = vmatprep.mubr.bf16.mxu0 %v2592_v43  ;;  %v359_v43 = vld [vmem:[%s3793_s27 + $0x3d8] sm:$0xff] }
 0x179   : > { %2134 = vmatprep.mubr.bf16.mxu1 %v2594_v47  ;;  %v363_v44 = vld [vmem:[%s3793_s27 + $0x3f8] sm:$0xff]  ;;  %v2607_v47 = vcombine.low %v350_v14, %v354_v15 }
 0x17a   : > { %v3927_v56 = vadd.f32 %v2988_v51, %v1561_v53  ;;  %v2877_v57 = vpop.f32.mrb[4].mxu0  ;;  %v2609_v51 = vcombine.low %v351_v18, %v355_v19  ;;  %v2616_v53 = vcombine.high %v358_v39, %v362_v40  ;;  %v2618_v58 = vcombine.high %v359_v43, %v363_v44 }
 0x17b   : > { %v2989_v60 = vpop.f32.mrb[4].mxu1  ;;  %v2878_v61 = vpop.f32.mrb[5].mxu0 }
 0x17c   : > { %v2879_v63 = vadd.f32 %v2878_v61, %v2877_v57  ;;  %v2990_v0 = vpop.f32.mrb[5].mxu1  ;;  %v2880_v1 = vpop.f32.mrb[6].mxu0 }
 0x17d   : > { %v2991_v4 = vadd.f32 %v2990_v0, %v2989_v60  ;;  %v2992_v5 = vpop.f32.mrb[6].mxu1  ;;  %v2881_v6 = vpop.f32.mrb[7].mxu0 }
 0x17e   : > { %v1566_v8 = vadd.f32 %v2879_v63, %v3919_v36  ;;  %v2882_v9 = vadd.f32 %v2881_v6, %v2880_v1  ;;  %v2993_v10 = vpop.f32.mrb[7].mxu1 }
 0x17f   : > { %v2994_v11 = vadd.f32 %v2993_v10, %v2992_v5  ;;  %1974 = vmatmul.mubr.bf16.gmra.mrb[112].mxu0 %v2591_v62  ;;  %v2615_v5 = vcombine.low %v358_v39, %v362_v40 }
 0x180   : > { %v3932_v12 = vadd.f32 %v2991_v4, %v1566_v8  ;;  %v1569_v13 = vadd.f32 %v2882_v9, %v3919_v36  ;;  %2135 = vmatmul.mubr.bf16.gmra.mrb[112].mxu1 %v2593_v2  ;;  %1981 = vmatprep.mubr.bf16.mxu0 %v2600_v3  ;;  %v2617_v9 = vcombine.low %v359_v43, %v363_v44 }
 0x181   : > { %2142 = vmatprep.mubr.bf16.mxu1 %v2602_v7 }
 0x182   : > { %v3937_v16 = vadd.f32 %v2994_v11, %v1569_v13  ;;  %v2883_v17 = vpop.f32.mrb[8].mxu0 }
 0x183   : > { %v2995_v20 = vpop.f32.mrb[8].mxu1  ;;  %v2884_v21 = vpop.f32.mrb[9].mxu0 }
 0x184   : > { %v2885_v23 = vadd.f32 %v2884_v21, %v2883_v17  ;;  %v2996_v24 = vpop.f32.mrb[9].mxu1  ;;  %v2886_v25 = vpop.f32.mrb[10].mxu0 }
 0x185   : > { %v2997_v28 = vadd.f32 %v2996_v24, %v2995_v20  ;;  %v2998_v29 = vpop.f32.mrb[10].mxu1  ;;  %v2887_v30 = vpop.f32.mrb[11].mxu0 }
 0x186   : > { %v1574_v32 = vadd.f32 %v2885_v23, %v3919_v36  ;;  %v2888_v33 = vadd.f32 %v2887_v30, %v2886_v25  ;;  %v2999_v34 = vpop.f32.mrb[11].mxu1 }
 0x187   : > { %v3000_v35 = vadd.f32 %v2999_v34, %v2998_v29  ;;  %1982 = vmatmul.mubr.bf16.gmra.mrb[116].mxu0 %v2599_v22 }
 0x188   : > { %v3942_v37 = vadd.f32 %v2997_v28, %v1574_v32  ;;  %v1577_v38 = vadd.f32 %v2888_v33, %v3919_v36  ;;  %2143 = vmatmul.mubr.bf16.gmra.mrb[116].mxu1 %v2601_v26  ;;  %1989 = vmatprep.mubr.bf16.mxu0 %v2608_v27 }
 0x189   : > { %2150 = vmatprep.mubr.bf16.mxu1 %v2610_v31 }
 0x18a   : > { %v3947_v41 = vadd.f32 %v3000_v35, %v1577_v38  ;;  %v2889_v42 = vpop.f32.mrb[12].mxu0 }
 0x18b   : > { %v3001_v45 = vpop.f32.mrb[12].mxu1  ;;  %v2890_v46 = vpop.f32.mrb[13].mxu0 }
 0x18c   : > { %v2891_v48 = vadd.f32 %v2890_v46, %v2889_v42  ;;  %v3002_v49 = vpop.f32.mrb[13].mxu1  ;;  %v2892_v50 = vpop.f32.mrb[14].mxu0 }
 0x18d   : > { %v3003_v54 = vadd.f32 %v3002_v49, %v3001_v45  ;;  %v3004_v55 = vpop.f32.mrb[14].mxu1  ;;  %v2893_v57 = vpop.f32.mrb[15].mxu0 }
 0x18e   : > { %v1582_v59 = vadd.f32 %v2891_v48, %v3919_v36  ;;  %v2894_v60 = vadd.f32 %v2893_v57, %v2892_v50  ;;  %v3005_v61 = vpop.f32.mrb[15].mxu1 }
 0x18f   : > { %v3006_v62 = vadd.f32 %v3005_v61, %v3004_v55  ;;  %1990 = vmatmul.mubr.bf16.gmra.mrb[120].mxu0 %v2607_v47 }
 0x190   : > { %v3952_v63 = vadd.f32 %v3003_v54, %v1582_v59  ;;  %v1585_v0 = vadd.f32 %v2894_v60, %v3919_v36  ;;  %2151 = vmatmul.mubr.bf16.gmra.mrb[120].mxu1 %v2609_v51  ;;  %1997 = vmatprep.mubr.bf16.mxu0 %v2616_v53 }
 0x191   : > { %2158 = vmatprep.mubr.bf16.mxu1 %v2618_v58 }
 0x192   : > { %v3955_v1 = vadd.f32 %v3006_v62, %v1585_v0  ;;  %v2895_v2 = vpop.f32.mrb[16].mxu0 }
 0x193   : > { %v3007_v3 = vpop.f32.mrb[16].mxu1  ;;  %v2896_v4 = vpop.f32.mrb[17].mxu0 }
 0x194   : > { %v2897_v6 = vadd.f32 %v2896_v4, %v2895_v2  ;;  %v3008_v7 = vpop.f32.mrb[17].mxu1  ;;  %v2898_v8 = vpop.f32.mrb[18].mxu0 }
 0x195   : > { %v3009_v10 = vadd.f32 %v3008_v7, %v3007_v3  ;;  %v3010_v11 = vpop.f32.mrb[18].mxu1  ;;  %v2899_v13 = vpop.f32.mrb[19].mxu0 }
 0x196   : > { %v1590_v14 = vadd.f32 %v2897_v6, %v3919_v36  ;;  %v2900_v15 = vadd.f32 %v2899_v13, %v2898_v8  ;;  %v3011_v17 = vpop.f32.mrb[19].mxu1 }
 0x197   : > { %v3012_v18 = vadd.f32 %v3011_v17, %v3010_v11  ;;  %1998 = vmatmul.mubr.bf16.gmra.mrb[124].mxu0 %v2615_v5 }
 0x198   : > { %v3958_v19 = vadd.f32 %v3009_v10, %v1590_v14  ;;  %v1593_v20 = vadd.f32 %v2900_v15, %v3919_v36  ;;  %2159 = vmatmul.mubr.bf16.gmra.mrb[124].mxu1 %v2617_v9 }
 0x19a   : > { %v3961_v21 = vadd.f32 %v3012_v18, %v1593_v20  ;;  %v2901_v22 = vpop.f32.mrb[20].mxu0 }
 0x19b   : > { %v3013_v23 = vpop.f32.mrb[20].mxu1  ;;  %v2902_v24 = vpop.f32.mrb[21].mxu0 }
 0x19c   : > { %v2903_v25 = vadd.f32 %v2902_v24, %v2901_v22  ;;  %v3014_v26 = vpop.f32.mrb[21].mxu1  ;;  %v2904_v27 = vpop.f32.mrb[22].mxu0 }
 0x19d   : > { %v3015_v28 = vadd.f32 %v3014_v26, %v3013_v23  ;;  %v3016_v29 = vpop.f32.mrb[22].mxu1  ;;  %v2905_v30 = vpop.f32.mrb[23].mxu0 }
 0x19e   : > { %v1598_v31 = vadd.f32 %v2903_v25, %v3919_v36  ;;  %v2906_v32 = vadd.f32 %v2905_v30, %v2904_v27  ;;  %v3017_v33 = vpop.f32.mrb[23].mxu1 }
 0x19f   : > { %v3018_v34 = vadd.f32 %v3017_v33, %v3016_v29 }
 0x1a0   : > { %v3964_v35 = vadd.f32 %v3015_v28, %v1598_v31  ;;  %v1601_v38 = vadd.f32 %v2906_v32, %v3919_v36 }
 0x1a2   : > { %v3967_v39 = vadd.f32 %v3018_v34, %v1601_v38  ;;  %v2907_v40 = vpop.f32.mrb[24].mxu0 }
 0x1a3   : > { %v3019_v42 = vpop.f32.mrb[24].mxu1  ;;  %v2908_v43 = vpop.f32.mrb[25].mxu0 }
 0x1a4   : > { %v2909_v44 = vadd.f32 %v2908_v43, %v2907_v40  ;;  %v3020_v45 = vpop.f32.mrb[25].mxu1  ;;  %v2910_v46 = vpop.f32.mrb[26].mxu0 }
 0x1a5   : > { %v3021_v47 = vadd.f32 %v3020_v45, %v3019_v42  ;;  %v3022_v48 = vpop.f32.mrb[26].mxu1  ;;  %v2911_v49 = vpop.f32.mrb[27].mxu0 }
 0x1a6   : > { %v1606_v50 = vadd.f32 %v2909_v44, %v3919_v36  ;;  %v2912_v51 = vadd.f32 %v2911_v49, %v2910_v46  ;;  %v3023_v53 = vpop.f32.mrb[27].mxu1 }
 0x1a7   : > { %v3024_v54 = vadd.f32 %v3023_v53, %v3022_v48 }
 0x1a8   : > { %v3970_v55 = vadd.f32 %v3021_v47, %v1606_v50  ;;  %v1609_v57 = vadd.f32 %v2912_v51, %v3919_v36 }
 0x1aa   : > { %v3973_v58 = vadd.f32 %v3024_v54, %v1609_v57  ;;  %v2913_v59 = vpop.f32.mrb[28].mxu0 }
 0x1ab   : > { %v3025_v60 = vpop.f32.mrb[28].mxu1  ;;  %v2914_v61 = vpop.f32.mrb[29].mxu0 }
 0x1ac   : > { %v2915_v62 = vadd.f32 %v2914_v61, %v2913_v59  ;;  %v3026_v0 = vpop.f32.mrb[29].mxu1  ;;  %v2916_v2 = vpop.f32.mrb[30].mxu0 }
 0x1ad   : > { %v3027_v3 = vadd.f32 %v3026_v0, %v3025_v60  ;;  %v3028_v4 = vpop.f32.mrb[30].mxu1  ;;  %v2917_v5 = vpop.f32.mrb[31].mxu0 }
 0x1ae   : > { %v1614_v6 = vadd.f32 %v2915_v62, %v3919_v36  ;;  %v2918_v7 = vadd.f32 %v2917_v5, %v2916_v2  ;;  %v3029_v8 = vpop.f32.mrb[31].mxu1 }
 0x1af   : > { %v3030_v9 = vadd.f32 %v3029_v8, %v3028_v4 }
 0x1b0   : > { %v3976_v10 = vadd.f32 %v3027_v3, %v1614_v6  ;;  %v1617_v11 = vadd.f32 %v2918_v7, %v3919_v36 }
 0x1b2   : > { %v3979_v13 = vadd.f32 %v3030_v9, %v1617_v11  ;;  %v2919_v14 = vpop.f32.mrb[32].mxu0 }
 0x1b3   : > { %v3031_v15 = vpop.f32.mrb[32].mxu1  ;;  %v2920_v17 = vpop.f32.mrb[33].mxu0 }
 0x1b4   : > { %v2921_v18 = vadd.f32 %v2920_v17, %v2919_v14  ;;  %v3032_v20 = vpop.f32.mrb[33].mxu1  ;;  %v2922_v22 = vpop.f32.mrb[34].mxu0 }
 0x1b5   : > { %v3033_v23 = vadd.f32 %v3032_v20, %v3031_v15  ;;  %v3034_v24 = vpop.f32.mrb[34].mxu1  ;;  %v2923_v25 = vpop.f32.mrb[35].mxu0 }
 0x1b6   : > { %v1622_v26 = vadd.f32 %v2921_v18, %v3919_v36  ;;  %v2924_v27 = vadd.f32 %v2923_v25, %v2922_v22  ;;  %v3035_v28 = vpop.f32.mrb[35].mxu1 }
 0x1b7   : > { %v3036_v29 = vadd.f32 %v3035_v28, %v3034_v24 }
 0x1b8   : > { %v3982_v30 = vadd.f32 %v3033_v23, %v1622_v26  ;;  %v1625_v31 = vadd.f32 %v2924_v27, %v3919_v36 }
 0x1ba   : > { %v3985_v32 = vadd.f32 %v3036_v29, %v1625_v31  ;;  %v2925_v33 = vpop.f32.mrb[36].mxu0 }
 0x1bb   : > { %v3037_v34 = vpop.f32.mrb[36].mxu1  ;;  %v2926_v38 = vpop.f32.mrb[37].mxu0 }
 0x1bc   : > { %v2927_v40 = vadd.f32 %v2926_v38, %v2925_v33  ;;  %v3038_v42 = vpop.f32.mrb[37].mxu1  ;;  %v2928_v43 = vpop.f32.mrb[38].mxu0 }
 0x1bd   : > { %v3039_v44 = vadd.f32 %v3038_v42, %v3037_v34  ;;  %v3040_v45 = vpop.f32.mrb[38].mxu1  ;;  %v2929_v46 = vpop.f32.mrb[39].mxu0 }
 0x1be   : > { %v1630_v47 = vadd.f32 %v2927_v40, %v3919_v36  ;;  %v2930_v48 = vadd.f32 %v2929_v46, %v2928_v43  ;;  %v3041_v49 = vpop.f32.mrb[39].mxu1 }
 0x1bf   : > { %v3042_v50 = vadd.f32 %v3041_v49, %v3040_v45 }
 0x1c0   : > { %v3988_v51 = vadd.f32 %v3039_v44, %v1630_v47  ;;  %v1633_v53 = vadd.f32 %v2930_v48, %v3919_v36 }
 0x1c2   : > { %v3991_v54 = vadd.f32 %v3042_v50, %v1633_v53  ;;  %v2931_v57 = vpop.f32.mrb[40].mxu0 }
 0x1c3   : > { %v3043_v59 = vpop.f32.mrb[40].mxu1  ;;  %v2932_v60 = vpop.f32.mrb[41].mxu0 }
 0x1c4   : > { %v2933_v61 = vadd.f32 %v2932_v60, %v2931_v57  ;;  %v3044_v62 = vpop.f32.mrb[41].mxu1  ;;  %v2934_v0 = vpop.f32.mrb[42].mxu0 }
 0x1c5   : > { %v3045_v2 = vadd.f32 %v3044_v62, %v3043_v59  ;;  %v3046_v3 = vpop.f32.mrb[42].mxu1  ;;  %v2935_v4 = vpop.f32.mrb[43].mxu0 }
 0x1c6   : > { %v1638_v5 = vadd.f32 %v2933_v61, %v3919_v36  ;;  %v2936_v6 = vadd.f32 %v2935_v4, %v2934_v0  ;;  %v3047_v7 = vpop.f32.mrb[43].mxu1 }
 0x1c7   : > { %v3048_v8 = vadd.f32 %v3047_v7, %v3046_v3 }
 0x1c8   : > { %v3994_v9 = vadd.f32 %v3045_v2, %v1638_v5  ;;  %v1641_v11 = vadd.f32 %v2936_v6, %v3919_v36 }
 0x1ca   : > { %v3997_v14 = vadd.f32 %v3048_v8, %v1641_v11  ;;  %v2937_v15 = vpop.f32.mrb[44].mxu0 }
 0x1cb   : > { %v3049_v17 = vpop.f32.mrb[44].mxu1  ;;  %v2938_v18 = vpop.f32.mrb[45].mxu0 }
 0x1cc   : > { %v2939_v20 = vadd.f32 %v2938_v18, %v2937_v15  ;;  %v3050_v22 = vpop.f32.mrb[45].mxu1  ;;  %v2940_v23 = vpop.f32.mrb[46].mxu0 }
 0x1cd   : > { %v3051_v24 = vadd.f32 %v3050_v22, %v3049_v17  ;;  %v3052_v25 = vpop.f32.mrb[46].mxu1  ;;  %v2941_v26 = vpop.f32.mrb[47].mxu0 }
 0x1ce   : > { %v1646_v27 = vadd.f32 %v2939_v20, %v3919_v36  ;;  %v2942_v28 = vadd.f32 %v2941_v26, %v2940_v23  ;;  %v3053_v29 = vpop.f32.mrb[47].mxu1 }
 0x1cf   : > { %v3054_v31 = vadd.f32 %v3053_v29, %v3052_v25 }
 0x1d0   : > { %v4000_v33 = vadd.f32 %v3051_v24, %v1646_v27  ;;  %v1649_v34 = vadd.f32 %v2942_v28, %v3919_v36 }
 0x1d2   : > { %v4003_v38 = vadd.f32 %v3054_v31, %v1649_v34  ;;  %v2943_v40 = vpop.f32.mrb[48].mxu0 }
 0x1d3   : > { %v3055_v42 = vpop.f32.mrb[48].mxu1  ;;  %v2944_v43 = vpop.f32.mrb[49].mxu0 }
 0x1d4   : > { %v2945_v44 = vadd.f32 %v2944_v43, %v2943_v40  ;;  %v3056_v45 = vpop.f32.mrb[49].mxu1  ;;  %v2946_v46 = vpop.f32.mrb[50].mxu0 }
 0x1d5   : > { %v3057_v47 = vadd.f32 %v3056_v45, %v3055_v42  ;;  %v3058_v48 = vpop.f32.mrb[50].mxu1  ;;  %v2947_v49 = vpop.f32.mrb[51].mxu0 }
 0x1d6   : > { %v1654_v50 = vadd.f32 %v2945_v44, %v3919_v36  ;;  %v2948_v53 = vadd.f32 %v2947_v49, %v2946_v46  ;;  %v3059_v57 = vpop.f32.mrb[51].mxu1 }
 0x1d7   : > { %v3060_v59 = vadd.f32 %v3059_v57, %v3058_v48 }
 0x1d8   : > { %v4006_v60 = vadd.f32 %v3057_v47, %v1654_v50  ;;  %v1657_v61 = vadd.f32 %v2948_v53, %v3919_v36 }
 0x1da   : > { %v4009_v62 = vadd.f32 %v3060_v59, %v1657_v61  ;;  %v2949_v0 = vpop.f32.mrb[52].mxu0 }
 0x1db   : > { %v3061_v2 = vpop.f32.mrb[52].mxu1  ;;  %v2950_v3 = vpop.f32.mrb[53].mxu0 }
 0x1dc   : > { %v2951_v4 = vadd.f32 %v2950_v3, %v2949_v0  ;;  %v3062_v5 = vpop.f32.mrb[53].mxu1  ;;  %v2952_v6 = vpop.f32.mrb[54].mxu0 }
 0x1dd   : > { %v3063_v7 = vadd.f32 %v3062_v5, %v3061_v2  ;;  %v3064_v8 = vpop.f32.mrb[54].mxu1  ;;  %v2953_v11 = vpop.f32.mrb[55].mxu0 }
 0x1de   : > { %v1662_v15 = vadd.f32 %v2951_v4, %v3919_v36  ;;  %v2954_v17 = vadd.f32 %v2953_v11, %v2952_v6  ;;  %v3065_v18 = vpop.f32.mrb[55].mxu1 }
 0x1df   : > { %v3066_v20 = vadd.f32 %v3065_v18, %v3064_v8 }
 0x1e0   : > { %v4012_v22 = vadd.f32 %v3063_v7, %v1662_v15  ;;  %v1665_v23 = vadd.f32 %v2954_v17, %v3919_v36 }
 0x1e2   : > { %v4015_v24 = vadd.f32 %v3066_v20, %v1665_v23  ;;  %v2955_v25 = vpop.f32.mrb[56].mxu0 }
 0x1e3   : > { %v3067_v26 = vpop.f32.mrb[56].mxu1  ;;  %v2956_v27 = vpop.f32.mrb[57].mxu0 }
 0x1e4   : > { %v2957_v28 = vadd.f32 %v2956_v27, %v2955_v25  ;;  %v3068_v29 = vpop.f32.mrb[57].mxu1  ;;  %v2958_v31 = vpop.f32.mrb[58].mxu0 }
 0x1e5   : > { %v3069_v34 = vadd.f32 %v3068_v29, %v3067_v26  ;;  %v3070_v40 = vpop.f32.mrb[58].mxu1  ;;  %v2959_v42 = vpop.f32.mrb[59].mxu0 }
 0x1e6   : > { %v1670_v43 = vadd.f32 %v2957_v28, %v3919_v36  ;;  %v2960_v44 = vadd.f32 %v2959_v42, %v2958_v31  ;;  %v3071_v45 = vpop.f32.mrb[59].mxu1 }
 0x1e7   : > { %v3072_v46 = vadd.f32 %v3071_v45, %v3070_v40 }
 0x1e8   : > { %v4018_v47 = vadd.f32 %v3069_v34, %v1670_v43  ;;  %v1673_v48 = vadd.f32 %v2960_v44, %v3919_v36 }
 0x1ea   : > { %v4021_v49 = vadd.f32 %v3072_v46, %v1673_v48  ;;  %v2961_v50 = vpop.f32.mrb[60].mxu0 }
 0x1eb   : > { %v3073_v53 = vpop.f32.mrb[60].mxu1  ;;  %v2962_v57 = vpop.f32.mrb[61].mxu0 }
 0x1ec   : > { %v2963_v59 = vadd.f32 %v2962_v57, %v2961_v50  ;;  %v3074_v61 = vpop.f32.mrb[61].mxu1  ;;  %v2964_v0 = vpop.f32.mrb[62].mxu0 }
 0x1ed   : > { %v3075_v2 = vadd.f32 %v3074_v61, %v3073_v53  ;;  %v3076_v3 = vpop.f32.mrb[62].mxu1  ;;  %v2965_v4 = vpop.f32.mrb[63].mxu0 }
 0x1ee   : > { %v1678_v5 = vadd.f32 %v2963_v59, %v3919_v36  ;;  %v2966_v6 = vadd.f32 %v2965_v4, %v2964_v0  ;;  %v3077_v7 = vpop.f32.mrb[63].mxu1 }
 0x1ef   : > { %v3078_v8 = vadd.f32 %v3077_v7, %v3076_v3 }
 0x1f0   : > { %v4024_v11 = vadd.f32 %v3075_v2, %v1678_v5  ;;  %v1681_v15 = vadd.f32 %v2966_v6, %v3919_v36 }
 0x1f2   : > { %v4027_v17 = vadd.f32 %v3078_v8, %v1681_v15  ;;  %v3095_v18 = vpop.f32.mrb[64].mxu0 }
 0x1f3   : > { %v3207_v20 = vpop.f32.mrb[64].mxu1  ;;  %v3096_v23 = vpop.f32.mrb[65].mxu0 }
 0x1f4   : > { %v3097_v25 = vadd.f32 %v3096_v23, %v3095_v18  ;;  %v3208_v26 = vpop.f32.mrb[65].mxu1  ;;  %v3098_v27 = vpop.f32.mrb[66].mxu0 }
 0x1f5   : > { %v3209_v28 = vadd.f32 %v3208_v26, %v3207_v20  ;;  %v3210_v29 = vpop.f32.mrb[66].mxu1  ;;  %v3099_v31 = vpop.f32.mrb[67].mxu0 }
 0x1f6   : > { %v1880_v34 = vadd.f32 %v3097_v25, %v3922_v52  ;;  %v3100_v40 = vadd.f32 %v3099_v31, %v3098_v27  ;;  %v3211_v42 = vpop.f32.mrb[67].mxu1 }
 0x1f7   : > { %v3212_v43 = vadd.f32 %v3211_v42, %v3210_v29 }
 0x1f8   : > { %v2041_v44 = vadd.f32 %v3209_v28, %v1880_v34  ;;  %v1883_v36 = vadd.f32 %v3100_v40, %v3927_v56 }
 0x1fa   : > { %v2044_v45 = vadd.f32 %v3212_v43, %v1883_v36  ;;  %v3101_v46 = vpop.f32.mrb[68].mxu0  ;;  %v2167_v53 = vmax.f32 %v2041_v44, 0.0 }
 0x1fb   : > { %v3213_v48 = vpop.f32.mrb[68].mxu1  ;;  %v3102_v50 = vpop.f32.mrb[69].mxu0 }
 0x1fc   : > { %v2168_v57 = vmax.f32 %v2044_v45, 0.0  ;;  %v3103_v59 = vadd.f32 %v3102_v50, %v3101_v46  ;;  %v3214_v61 = vpop.f32.mrb[69].mxu1  ;;  %v3104_v0 = vpop.f32.mrb[70].mxu0 }
 0x1fd   : > { %v3215_v2 = vadd.f32 %v3214_v61, %v3213_v48  ;;  %v3216_v3 = vpop.f32.mrb[70].mxu1  ;;  %v3105_v4 = vpop.f32.mrb[71].mxu0 }
 0x1fe   : > { %v2763_v52 = vpack.c.bf16 %v2168_v57, %v2167_v53  ;;  %v1888_v5 = vadd.f32 %v3103_v59, %v3932_v12  ;;  %v3106_v6 = vadd.f32 %v3105_v4, %v3104_v0  ;;  %v3217_v7 = vpop.f32.mrb[71].mxu1 }
 0x1ff   : > { %v3218_v8 = vadd.f32 %v3217_v7, %v3216_v3 }
 0x200   : > { %2764 = vst [vmem:[%s4033_s26] sm:$0xff] %v2763_v52   ;;  %v2049_v56 = vadd.f32 %v3215_v2, %v1888_v5  ;;  %v1891_v15 = vadd.f32 %v3106_v6, %v3937_v16 }
 0x202   : > { %v2052_v18 = vadd.f32 %v3218_v8, %v1891_v15  ;;  %v3107_v20 = vpop.f32.mrb[72].mxu0  ;;  %v2169_v26 = vmax.f32 %v2049_v56, 0.0 }
 0x203   : > { %v3219_v23 = vpop.f32.mrb[72].mxu1  ;;  %v3108_v25 = vpop.f32.mrb[73].mxu0 }
 0x204   : > { %v2170_v27 = vmax.f32 %v2052_v18, 0.0  ;;  %v3109_v28 = vadd.f32 %v3108_v25, %v3107_v20  ;;  %v3220_v29 = vpop.f32.mrb[73].mxu1  ;;  %v3110_v12 = vpop.f32.mrb[74].mxu0 }
 0x205   : > { %v3221_v31 = vadd.f32 %v3220_v29, %v3219_v23  ;;  %v3222_v34 = vpop.f32.mrb[74].mxu1  ;;  %v3111_v40 = vpop.f32.mrb[75].mxu0 }
 0x206   : > { %v2768_v42 = vpack.c.bf16 %v2170_v27, %v2169_v26  ;;  %v1896_v43 = vadd.f32 %v3109_v28, %v3942_v37  ;;  %v3112_v44 = vadd.f32 %v3111_v40, %v3110_v12  ;;  %v3223_v36 = vpop.f32.mrb[75].mxu1 }
 0x207   : > { %v3224_v45 = vadd.f32 %v3223_v36, %v3222_v34 }
 0x208   : > { %2840 = vst [vmem:[%s4033_s26 + $0x8] sm:$0xff] %v2768_v42   ;;  %v2057_v16 = vadd.f32 %v3221_v31, %v1896_v43  ;;  %v1899_v46 = vadd.f32 %v3112_v44, %v3947_v41 }
 0x20a   : > { %v2060_v48 = vadd.f32 %v3224_v45, %v1899_v46  ;;  %v3113_v50 = vpop.f32.mrb[76].mxu0  ;;  %v2171_v59 = vmax.f32 %v2057_v16, 0.0 }
 0x20b   : > { %v3225_v53 = vpop.f32.mrb[76].mxu1  ;;  %v3114_v57 = vpop.f32.mrb[77].mxu0 }
 0x20c   : > { %v2172_v61 = vmax.f32 %v2060_v48, 0.0  ;;  %v3115_v0 = vadd.f32 %v3114_v57, %v3113_v50  ;;  %v3226_v2 = vpop.f32.mrb[77].mxu1  ;;  %v3116_v3 = vpop.f32.mrb[78].mxu0 }
 0x20d   : > { %v3227_v4 = vadd.f32 %v3226_v2, %v3225_v53  ;;  %v3228_v52 = vpop.f32.mrb[78].mxu1  ;;  %v3117_v37 = vpop.f32.mrb[79].mxu0 }
 0x20e   : > { %v2773_v5 = vpack.c.bf16 %v2172_v61, %v2171_v59  ;;  %v1904_v6 = vadd.f32 %v3115_v0, %v3952_v63  ;;  %v3118_v7 = vadd.f32 %v3117_v37, %v3116_v3  ;;  %v3229_v8 = vpop.f32.mrb[79].mxu1 }
 0x20f   : > { %v3230_v56 = vadd.f32 %v3229_v8, %v3228_v52 }
 0x210   : > { %2841 = vst [vmem:[%s4033_s26 + $0x10] sm:$0xff] %v2773_v5   ;;  %v2065_v41 = vadd.f32 %v3227_v4, %v1904_v6  ;;  %v1907_v15 = vadd.f32 %v3118_v7, %v3955_v1 }
 0x212   : > { %v2068_v18 = vadd.f32 %v3230_v56, %v1907_v15  ;;  %v3119_v20 = vpop.f32.mrb[80].mxu0  ;;  %v2173_v26 = vmax.f32 %v2065_v41, 0.0 }
 0x213   : > { %v3231_v23 = vpop.f32.mrb[80].mxu1  ;;  %v3120_v25 = vpop.f32.mrb[81].mxu0 }
 0x214   : > { %v2174_v27 = vmax.f32 %v2068_v18, 0.0  ;;  %v3121_v28 = vadd.f32 %v3120_v25, %v3119_v20  ;;  %v3232_v29 = vpop.f32.mrb[81].mxu1  ;;  %v3122_v12 = vpop.f32.mrb[82].mxu0 }
 0x215   : > { %v3233_v31 = vadd.f32 %v3232_v29, %v3231_v23  ;;  %v3234_v34 = vpop.f32.mrb[82].mxu1  ;;  %v3123_v63 = vpop.f32.mrb[83].mxu0 }
 0x216   : > { %v2778_v40 = vpack.c.bf16 %v2174_v27, %v2173_v26  ;;  %v1912_v42 = vadd.f32 %v3121_v28, %v3958_v19  ;;  %v3124_v43 = vadd.f32 %v3123_v63, %v3122_v12  ;;  %v3235_v44 = vpop.f32.mrb[83].mxu1 }
 0x217   : > { %v3236_v36 = vadd.f32 %v3235_v44, %v3234_v34 }
 0x218   : > { %2842 = vst [vmem:[%s4033_s26 + $0x18] sm:$0xff] %v2778_v40   ;;  %v2073_v1 = vadd.f32 %v3233_v31, %v1912_v42  ;;  %v1915_v45 = vadd.f32 %v3124_v43, %v3961_v21 }
 0x21a   : > { %v2076_v16 = vadd.f32 %v3236_v36, %v1915_v45  ;;  %v3125_v46 = vpop.f32.mrb[84].mxu0  ;;  %v2175_v53 = vmax.f32 %v2073_v1, 0.0 }
 0x21b   : > { %v3237_v48 = vpop.f32.mrb[84].mxu1  ;;  %v3126_v50 = vpop.f32.mrb[85].mxu0 }
 0x21c   : > { %v2176_v57 = vmax.f32 %v2076_v16, 0.0  ;;  %v3127_v59 = vadd.f32 %v3126_v50, %v3125_v46  ;;  %v3238_v61 = vpop.f32.mrb[85].mxu1  ;;  %v3128_v0 = vpop.f32.mrb[86].mxu0 }
 0x21d   : > { %v3239_v2 = vadd.f32 %v3238_v61, %v3237_v48  ;;  %v3240_v3 = vpop.f32.mrb[86].mxu1  ;;  %v3129_v19 = vpop.f32.mrb[87].mxu0 }
 0x21e   : > { %v2783_v4 = vpack.c.bf16 %v2176_v57, %v2175_v53  ;;  %v1920_v52 = vadd.f32 %v3127_v59, %v3964_v35  ;;  %v3130_v37 = vadd.f32 %v3129_v19, %v3128_v0  ;;  %v3241_v5 = vpop.f32.mrb[87].mxu1 }
 0x21f   : > { %v3242_v6 = vadd.f32 %v3241_v5, %v3240_v3 }
 0x220   : > { %2843 = vst [vmem:[%s4033_s26 + $0x20] sm:$0xff] %v2783_v4   ;;  %v2081_v21 = vadd.f32 %v3239_v2, %v1920_v52  ;;  %v1923_v7 = vadd.f32 %v3130_v37, %v3967_v39 }
 0x222   : > { %v2084_v8 = vadd.f32 %v3242_v6, %v1923_v7  ;;  %v3131_v56 = vpop.f32.mrb[88].mxu0  ;;  %v2177_v18 = vmax.f32 %v2081_v21, 0.0 }
 0x223   : > { %v3243_v41 = vpop.f32.mrb[88].mxu1  ;;  %v3132_v15 = vpop.f32.mrb[89].mxu0 }
 0x224   : > { %v2178_v20 = vmax.f32 %v2084_v8, 0.0  ;;  %v3133_v23 = vadd.f32 %v3132_v15, %v3131_v56  ;;  %v3244_v25 = vpop.f32.mrb[89].mxu1  ;;  %v3134_v26 = vpop.f32.mrb[90].mxu0 }
 0x225   : > { %v3245_v27 = vadd.f32 %v3244_v25, %v3243_v41  ;;  %v3246_v28 = vpop.f32.mrb[90].mxu1  ;;  %v3135_v35 = vpop.f32.mrb[91].mxu0 }
 0x226   : > { %v2788_v29 = vpack.c.bf16 %v2178_v20, %v2177_v18  ;;  %v1928_v12 = vadd.f32 %v3133_v23, %v3970_v55  ;;  %v3136_v31 = vadd.f32 %v3135_v35, %v3134_v26  ;;  %v3247_v34 = vpop.f32.mrb[91].mxu1 }
 0x227   : > { %v3248_v63 = vadd.f32 %v3247_v34, %v3246_v28 }
 0x228   : > { %2844 = vst [vmem:[%s4033_s26 + $0x28] sm:$0xff] %v2788_v29   ;;  %v2089_v39 = vadd.f32 %v3245_v27, %v1928_v12  ;;  %v1931_v40 = vadd.f32 %v3136_v31, %v3973_v58 }
 0x22a   : > { %v2092_v42 = vadd.f32 %v3248_v63, %v1931_v40  ;;  %v3137_v43 = vpop.f32.mrb[92].mxu0  ;;  %v2179_v1 = vmax.f32 %v2089_v39, 0.0 }
 0x22b   : > { %v3249_v44 = vpop.f32.mrb[92].mxu1  ;;  %v3138_v36 = vpop.f32.mrb[93].mxu0 }
 0x22c   : > { %v2180_v45 = vmax.f32 %v2092_v42, 0.0  ;;  %v3139_v16 = vadd.f32 %v3138_v36, %v3137_v43  ;;  %v3250_v46 = vpop.f32.mrb[93].mxu1  ;;  %v3140_v48 = vpop.f32.mrb[94].mxu0 }
 0x22d   : > { %v3251_v50 = vadd.f32 %v3250_v46, %v3249_v44  ;;  %v3252_v53 = vpop.f32.mrb[94].mxu1  ;;  %v3141_v55 = vpop.f32.mrb[95].mxu0 }
 0x22e   : > { %v2793_v57 = vpack.c.bf16 %v2180_v45, %v2179_v1  ;;  %v1936_v59 = vadd.f32 %v3139_v16, %v3976_v10  ;;  %v3142_v61 = vadd.f32 %v3141_v55, %v3140_v48  ;;  %v3253_v0 = vpop.f32.mrb[95].mxu1 }
 0x22f   : > { %v3254_v2 = vadd.f32 %v3253_v0, %v3252_v53 }
 0x230   : > { %2845 = vst [vmem:[%s4033_s26 + $0x30] sm:$0xff] %v2793_v57   ;;  %v2097_v58 = vadd.f32 %v3251_v50, %v1936_v59  ;;  %v1939_v3 = vadd.f32 %v3142_v61, %v3979_v13 }
 0x232   : > { %v2100_v19 = vadd.f32 %v3254_v2, %v1939_v3  ;;  %v3143_v4 = vpop.f32.mrb[96].mxu0  ;;  %v2181_v5 = vmax.f32 %v2097_v58, 0.0 }
 0x233   : > { %v3255_v52 = vpop.f32.mrb[96].mxu1  ;;  %v3144_v37 = vpop.f32.mrb[97].mxu0 }
 0x234   : > { %v2182_v6 = vmax.f32 %v2100_v19, 0.0  ;;  %v3145_v21 = vadd.f32 %v3144_v37, %v3143_v4  ;;  %v3256_v7 = vpop.f32.mrb[97].mxu1  ;;  %v3146_v8 = vpop.f32.mrb[98].mxu0 }
 0x235   : > { %v3257_v56 = vadd.f32 %v3256_v7, %v3255_v52  ;;  %v3258_v41 = vpop.f32.mrb[98].mxu1  ;;  %v3147_v10 = vpop.f32.mrb[99].mxu0 }
 0x236   : > { %v2798_v15 = vpack.c.bf16 %v2182_v6, %v2181_v5  ;;  %v1944_v18 = vadd.f32 %v3145_v21, %v3982_v30  ;;  %v3148_v20 = vadd.f32 %v3147_v10, %v3146_v8  ;;  %v3259_v23 = vpop.f32.mrb[99].mxu1 }
 0x237   : > { %v3260_v25 = vadd.f32 %v3259_v23, %v3258_v41 }
 0x238   : > { %2846 = vst [vmem:[%s4033_s26 + $0x38] sm:$0xff] %v2798_v15   ;;  %v2105_v13 = vadd.f32 %v3257_v56, %v1944_v18  ;;  %v1947_v26 = vadd.f32 %v3148_v20, %v3985_v32 }
 0x23a   : > { %v2108_v27 = vadd.f32 %v3260_v25, %v1947_v26  ;;  %v3149_v28 = vpop.f32.mrb[100].mxu0  ;;  %v2183_v12 = vmax.f32 %v2105_v13, 0.0 }
 0x23b   : > { %v3261_v35 = vpop.f32.mrb[100].mxu1  ;;  %v3150_v29 = vpop.f32.mrb[101].mxu0 }
 0x23c   : > { %v2184_v31 = vmax.f32 %v2108_v27, 0.0  ;;  %v3151_v34 = vadd.f32 %v3150_v29, %v3149_v28  ;;  %v3262_v63 = vpop.f32.mrb[101].mxu1  ;;  %v3152_v39 = vpop.f32.mrb[102].mxu0 }
 0x23d   : > { %v3263_v40 = vadd.f32 %v3262_v63, %v3261_v35  ;;  %v3264_v42 = vpop.f32.mrb[102].mxu1  ;;  %v3153_v30 = vpop.f32.mrb[103].mxu0 }
 0x23e   : > { %v2803_v43 = vpack.c.bf16 %v2184_v31, %v2183_v12  ;;  %v1952_v44 = vadd.f32 %v3151_v34, %v3988_v51  ;;  %v3154_v36 = vadd.f32 %v3153_v30, %v3152_v39  ;;  %v3265_v1 = vpop.f32.mrb[103].mxu1 }
 0x23f   : > { %v3266_v45 = vadd.f32 %v3265_v1, %v3264_v42 }
 0x240   : > { %2847 = vst [vmem:[%s4033_s26 + $0x40] sm:$0xff] %v2803_v43   ;;  %v2113_v32 = vadd.f32 %v3263_v40, %v1952_v44  ;;  %v1955_v16 = vadd.f32 %v3154_v36, %v3991_v54 }
 0x242   : > { %v2116_v46 = vadd.f32 %v3266_v45, %v1955_v16  ;;  %v3155_v48 = vpop.f32.mrb[104].mxu0  ;;  %v2185_v55 = vmax.f32 %v2113_v32, 0.0 }
 0x243   : > { %v3267_v50 = vpop.f32.mrb[104].mxu1  ;;  %v3156_v53 = vpop.f32.mrb[105].mxu0 }
 0x244   : > { %v2186_v57 = vmax.f32 %v2116_v46, 0.0  ;;  %v3157_v59 = vadd.f32 %v3156_v53, %v3155_v48  ;;  %v3268_v61 = vpop.f32.mrb[105].mxu1  ;;  %v3158_v0 = vpop.f32.mrb[106].mxu0 }
 0x245   : > { %v3269_v2 = vadd.f32 %v3268_v61, %v3267_v50  ;;  %v3270_v58 = vpop.f32.mrb[106].mxu1  ;;  %v3159_v51 = vpop.f32.mrb[107].mxu0 }
 0x246   : > { %v2808_v3 = vpack.c.bf16 %v2186_v57, %v2185_v55  ;;  %v1960_v19 = vadd.f32 %v3157_v59, %v3994_v9  ;;  %v3160_v4 = vadd.f32 %v3159_v51, %v3158_v0  ;;  %v3271_v52 = vpop.f32.mrb[107].mxu1 }
 0x247   : > { %v3272_v37 = vadd.f32 %v3271_v52, %v3270_v58 }
 0x248   : > { %2848 = vst [vmem:[%s4033_s26 + $0x48] sm:$0xff] %v2808_v3   ;;  %v2121_v54 = vadd.f32 %v3269_v2, %v1960_v19  ;;  %v1963_v5 = vadd.f32 %v3160_v4, %v3997_v14 }
 0x24a   : > { %v2124_v6 = vadd.f32 %v3272_v37, %v1963_v5  ;;  %v3161_v21 = vpop.f32.mrb[108].mxu0  ;;  %v2187_v56 = vmax.f32 %v2121_v54, 0.0 }
 0x24b   : > { %v3273_v7 = vpop.f32.mrb[108].mxu1  ;;  %v3162_v8 = vpop.f32.mrb[109].mxu0 }
 0x24c   : > { %v2188_v41 = vmax.f32 %v2124_v6, 0.0  ;;  %v3163_v10 = vadd.f32 %v3162_v8, %v3161_v21  ;;  %v3274_v15 = vpop.f32.mrb[109].mxu1  ;;  %v3164_v18 = vpop.f32.mrb[110].mxu0 }
 0x24d   : > { %v3275_v20 = vadd.f32 %v3274_v15, %v3273_v7  ;;  %v3276_v23 = vpop.f32.mrb[110].mxu1  ;;  %v3165_v9 = vpop.f32.mrb[111].mxu0 }
 0x24e   : > { %v2813_v25 = vpack.c.bf16 %v2188_v41, %v2187_v56  ;;  %v1968_v13 = vadd.f32 %v3163_v10, %v4000_v33  ;;  %v3166_v26 = vadd.f32 %v3165_v9, %v3164_v18  ;;  %v3277_v27 = vpop.f32.mrb[111].mxu1 }
 0x24f   : > { %v3278_v28 = vadd.f32 %v3277_v27, %v3276_v23 }
 0x250   : > { %2849 = vst [vmem:[%s4033_s26 + $0x50] sm:$0xff] %v2813_v25   ;;  %v2129_v14 = vadd.f32 %v3275_v20, %v1968_v13  ;;  %v1971_v35 = vadd.f32 %v3166_v26, %v4003_v38 }
 0x252   : > { %v2132_v29 = vadd.f32 %v3278_v28, %v1971_v35  ;;  %v3167_v12 = vpop.f32.mrb[112].mxu0  ;;  %v2189_v63 = vmax.f32 %v2129_v14, 0.0 }
 0x253   : > { %v3279_v31 = vpop.f32.mrb[112].mxu1  ;;  %v3168_v34 = vpop.f32.mrb[113].mxu0 }
 0x254   : > { %v2190_v39 = vmax.f32 %v2132_v29, 0.0  ;;  %v3169_v40 = vadd.f32 %v3168_v34, %v3167_v12  ;;  %v3280_v42 = vpop.f32.mrb[113].mxu1  ;;  %v3170_v30 = vpop.f32.mrb[114].mxu0 }
 0x255   : > { %v3281_v43 = vadd.f32 %v3280_v42, %v3279_v31  ;;  %v3282_v44 = vpop.f32.mrb[114].mxu1  ;;  %v3171_v33 = vpop.f32.mrb[115].mxu0 }
 0x256   : > { %v2818_v36 = vpack.c.bf16 %v2190_v39, %v2189_v63  ;;  %v1976_v1 = vadd.f32 %v3169_v40, %v4006_v60  ;;  %v3172_v45 = vadd.f32 %v3171_v33, %v3170_v30  ;;  %v3283_v32 = vpop.f32.mrb[115].mxu1 }
 0x257   : > { %v3284_v16 = vadd.f32 %v3283_v32, %v3282_v44 }
 0x258   : > { %2850 = vst [vmem:[%s4033_s26 + $0x58] sm:$0xff] %v2818_v36   ;;  %v2137_v38 = vadd.f32 %v3281_v43, %v1976_v1  ;;  %v1979_v46 = vadd.f32 %v3172_v45, %v4009_v62 }
 0x25a   : > { %v2140_v48 = vadd.f32 %v3284_v16, %v1979_v46  ;;  %v3173_v50 = vpop.f32.mrb[116].mxu0  ;;  %v2191_v57 = vmax.f32 %v2137_v38, 0.0 }
 0x25b   : > { %v3285_v53 = vpop.f32.mrb[116].mxu1  ;;  %v3174_v55 = vpop.f32.mrb[117].mxu0 }
 0x25c   : > { %v2192_v59 = vmax.f32 %v2140_v48, 0.0  ;;  %v3175_v61 = vadd.f32 %v3174_v55, %v3173_v50  ;;  %v3286_v0 = vpop.f32.mrb[117].mxu1  ;;  %v3176_v2 = vpop.f32.mrb[118].mxu0 }
 0x25d   : > { %v3287_v58 = vadd.f32 %v3286_v0, %v3285_v53  ;;  %v3288_v51 = vpop.f32.mrb[118].mxu1  ;;  %v3177_v60 = vpop.f32.mrb[119].mxu0 }
 0x25e   : > { %v2823_v3 = vpack.c.bf16 %v2192_v59, %v2191_v57  ;;  %v1984_v19 = vadd.f32 %v3175_v61, %v4012_v22  ;;  %v3178_v4 = vadd.f32 %v3177_v60, %v3176_v2  ;;  %v3289_v52 = vpop.f32.mrb[119].mxu1 }
 0x25f   : > { %v3290_v37 = vadd.f32 %v3289_v52, %v3288_v51 }
 0x260   : > { %2851 = vst [vmem:[%s4033_s26 + $0x60] sm:$0xff] %v2823_v3   ;;  %v2145_v62 = vadd.f32 %v3287_v58, %v1984_v19  ;;  %v1987_v54 = vadd.f32 %v3178_v4, %v4015_v24 }
 0x262   : > { %v2148_v5 = vadd.f32 %v3290_v37, %v1987_v54  ;;  %v3179_v6 = vpop.f32.mrb[120].mxu0  ;;  %v2193_v8 = vmax.f32 %v2145_v62, 0.0 }
 0x263   : > { %v3291_v21 = vpop.f32.mrb[120].mxu1  ;;  %v3180_v7 = vpop.f32.mrb[121].mxu0 }
 0x264   : > { %v2194_v56 = vmax.f32 %v2148_v5, 0.0  ;;  %v3181_v41 = vadd.f32 %v3180_v7, %v3179_v6  ;;  %v3292_v10 = vpop.f32.mrb[121].mxu1  ;;  %v3182_v15 = vpop.f32.mrb[122].mxu0 }
 0x265   : > { %v3293_v18 = vadd.f32 %v3292_v10, %v3291_v21  ;;  %v3294_v20 = vpop.f32.mrb[122].mxu1  ;;  %v3183_v22 = vpop.f32.mrb[123].mxu0 }
 0x266   : > { %v2828_v23 = vpack.c.bf16 %v2194_v56, %v2193_v8  ;;  %v1992_v9 = vadd.f32 %v3181_v41, %v4018_v47  ;;  %v3184_v25 = vadd.f32 %v3183_v22, %v3182_v15  ;;  %v3295_v13 = vpop.f32.mrb[123].mxu1 }
 0x267   : > { %v3296_v26 = vadd.f32 %v3295_v13, %v3294_v20 }
 0x268   : > { %2852 = vst [vmem:[%s4033_s26 + $0x68] sm:$0xff] %v2828_v23   ;;  %v2153_v24 = vadd.f32 %v3293_v18, %v1992_v9  ;;  %v1995_v27 = vadd.f32 %v3184_v25, %v4021_v49 }
 0x26a   : > { %v2156_v28 = vadd.f32 %v3296_v26, %v1995_v27  ;;  %v3185_v14 = vpop.f32.mrb[124].mxu0  ;;  %v2195_v12 = vmax.f32 %v2153_v24, 0.0 }
 0x26b   : > { %v3297_v35 = vpop.f32.mrb[124].mxu1  ;;  %v3186_v29 = vpop.f32.mrb[125].mxu0 }
 0x26c   : > { %v2196_v31 = vmax.f32 %v2156_v28, 0.0  ;;  %v3187_v34 = vadd.f32 %v3186_v29, %v3185_v14  ;;  %v3298_v63 = vpop.f32.mrb[125].mxu1  ;;  %v3188_v39 = vpop.f32.mrb[126].mxu0 }
 0x26d   : > { %v3299_v40 = vadd.f32 %v3298_v63, %v3297_v35  ;;  %v3300_v47 = vpop.f32.mrb[126].mxu1  ;;  %v3189_v42 = vpop.f32.mrb[127].mxu0 }
 0x26e   : > { %v2833_v30 = vpack.c.bf16 %v2196_v31, %v2195_v12  ;;  %v2000_v43 = vadd.f32 %v3187_v34, %v4024_v11  ;;  %v3190_v44 = vadd.f32 %v3189_v42, %v3188_v39  ;;  %v3301_v49 = vpop.f32.mrb[127].mxu1 }
 0x26f   : > { %v3302_v33 = vadd.f32 %v3301_v49, %v3300_v47 }
 0x270   : > { %2853 = vst [vmem:[%s4033_s26 + $0x70] sm:$0xff] %v2833_v30   ;;  %v2161_v36 = vadd.f32 %v3299_v40, %v2000_v43  ;;  %v2003_v1 = vadd.f32 %v3190_v44, %v4027_v17 }
 0x272   : > { %v2164_v45 = vadd.f32 %v3302_v33, %v2003_v1  ;;  %v2197_v32 = vmax.f32 %v2161_v36, 0.0  ;;  %2366 = sbr.rel (!%p4160_p8) target bundleno = 661 (0x295), region = 48 }
 0x274   : > { %v2198_v16 = vmax.f32 %v2164_v45, 0.0 }
 0x276   : > { %v2838_v38 = vpack.c.bf16 %v2198_v16, %v2197_v32 }
 0x278   : > { %2854 = vst [vmem:[%s4033_s26 + $0x78] sm:$0xff] %v2838_v38  }
 0x279   : > { %s4169_s11 = smov (!%p2369_p9, %s2368_s11), 32 }
 0x27a   : > { %s4084_s28 = sshll.u32 %s4169_s11, 6 }
 0x27b   : > { %s2373_s30 = ssub.s32 2048, %s4084_s28 }
 0x27c   : > { %2374 = vsyncadd %s2360_s29, %s2373_s30  ;;  %p2718_p10 = scmp.ne.s32.totalorder %s4084_s28, 0  ;;  %s2759_s24 = sshll.u32 %s3640_s16, 11 }
 0x27d   : > { %s4094_s7 = scalar_lea.hbm %s4145_s3, %s2759_s24  ;;  %s2379_s4 = sshll.u32 %s4033_s26, 4  ;;  %s4097_s4 = int_to_ptr.vmem [resolvable:$true] %s2379_s4 }
 0x27e   : > { %s3517_s22 = scalar_lea.vmem %s4097_s4, %s4084_s28  ;;  %s3596_s9 = smov [#allocation8]  }
 0x27f   : > { %p3518_p1 = scmp.ne.s32.totalorder %s4097_s4, %s3517_s22  ;;  %s3521_s10 = sshll.u32 %s3596_s9, 4  ;;  %s3522_s10 = int_to_ptr.vmem [resolvable:$false] %s3521_s10 }
 0x280   : > { %s3523_s16 = scalar_lea.vmem %s3522_s10, 4096  ;;  %p3524_p5 = scmp.lt.s32.totalorder %s4097_s4, %s3522_s10 }
 0x281   : > { %p3519_p4 = pnand %p3518_p1, %p2718_p10  ;;  %p3525_p6 = scmp.lt.s32.totalorder %s3523_s16, %s3517_s22 }
 0x283   : > { %p3520_p3 = pneg %p3519_p4  ;;  %p3526_p11 = por %p3525_p6, %p3524_p5 }
 0x285   : > { %p3527_p13 = pnand %p3526_p11, %p3520_p3 }
 0x287   : > { %3530 = shalt.err (!%p3527_p13)
}
 0x288   : > { %s3531_s19 = scalar_lea.hbm %s4094_s7, %s4084_s28  ;;  %s3535_s23 = scalar_lea.hbm %s4145_s3, 5632 }
 0x289   : > { %p3532_p12 = scmp.ne.s32.totalorder %s4094_s7, %s3531_s19  ;;  %p3536_p7 = scmp.lt.u32.totalorder %s4094_s7, %s4145_s3 }
 0x28a   : > { %p3537_p8 = scmp.lt.u32.totalorder %s3535_s23, %s3531_s19  ;;  %p3539_p1 = scmp.lt.u32.totalorder %s3531_s19, %s4094_s7 }
 0x28b   : > { %p3533_p0 = pnand %p3532_p12, %p2718_p10 }
 0x28c   : > { %p3538_p9 = por %p3537_p8, %p3536_p7 }
 0x28d   : > { %p3534_p2 = pneg %p3533_p0 }
 0x28e   : > { %p3540_p4 = por %p3539_p1, %p3538_p9 }
 0x290   : > { %p3541_p3 = pnand %p3540_p4, %p3534_p2 }
 0x292   : > { %3544 = shalt.err (!%p3541_p3)
}
 0x293   : > { %s3597_s11 = smov 64   ;;  %s3598_s30 = smov 4  }
 0x294   : > { %2385 = dma.vmem_to_hbm [thread:$0]  (%p2718_p10), %s4097_s4, %s4084_s28, %s4094_s7, %s2360_s29, %s3597_s11, %s3597_s11, %s3598_s30  }
 0x295 PF: > { %p3328_p5 = scmp.ge.s32.totalorder %s3587_s15, 2  ;;  %s2394_s24 = sand.u32 1, %s3575_s12  }
 0x296   : > { %p4161_p6 = scmp.ne.s32.totalorder %s4152_s25, 0  ;;  %s2395_s5 = scalar_lea.sflag [#allocation4], %s2394_s24 }
 0x298   : > { %p3321_p11 = pnand %p3328_p5, %p4161_p6 }
 0x29a   : > { %3570 = dma.done.wait (!%p3321_p11), %s2395_s5, 2048  }
 0x29b   : > { %3572 = vsyncadd (!%p3321_p11), %s2395_s5, 4294965248  ;;  %p17_p13 = scmp.ge.s32.totalorder %s3644_s18, 5   ;;  %s4162_s12 = smov %s3579_s13 }
 0x29c   : > { %s4163_s13 = smov %s3583_s14  ;;  %s4164_s14 = smov %s3656_s21 }
 0x29d   : > { %s4165_s15 = smov %s3644_s18  ;;  %19 = sbr.rel (!%p17_p13) target bundleno = 6 (0x6), region = 85 }
 0x2a4   :  { %2400 = vsyncpa [#allocation3], 1 }
 0x2a5   :  { %2402 = vsyncpa [#allocation3 + $0x1], 1 }
 0x2a6   :  { %2403 = vsyncpa [#allocation6], 1 }
 0x2a7   :  { %2404 = vsyncpa [#allocation4], 1 }
 0x2a8   :  { %2406 = vsyncpa [#allocation4 + $0x1], 1 }

</bundles_post_ra>
